<compile_context>
chip_gen: v7x
topology: tpu7x:2x2x1
jax: 0.10.0
libtpu: 0.0.40
codegen_flags: <defaults>
</compile_context>

<pallas_src>
import math

import jax
import jax.numpy as jnp
import numpy as np
from jax.experimental import pallas as pl
from jax.experimental.pallas import tpu as pltpu

NODES = 32      # hidden width of self.P ("nodes" in the PyTorch source)
NHIDDEN = 10    # number of hidden Linear+SiLU blocks
NOUT = 23       # noutputs
NFEAT = 6       # mhh, klambda, ct, ctt, cggh, cgghh


def _silu(h):
    # h * sigmoid(h) == 0.5 * h * (1 + tanh(0.5 * h)).
    # One EUP op (tanh) instead of exp + reciprocal -> halves EUP traffic.
    return 0.5 * h * (1.0 + jnp.tanh(0.5 * h))


def heftnet_kernel(x_ref, w0_ref, b0_ref, wh_ref, bh_ref, wl_ref, bl_ref,
                   qw_ref, out_ref):
    """One batch-tile of the HEFTNet forward pass, entirely in VMEM.

    x_ref:  (6, tn)           feature-major input tile
    w0_ref: (NODES, 1)        first-layer weight column (Linear(1, nodes)^T)
    b0_ref: (NODES, 1)
    wh_ref: (NHIDDEN, NODES, NODES)   hidden weights, already transposed
    bh_ref: (NHIDDEN, NODES, 1)
    wl_ref: (NOUT, NODES)     last-layer weight, transposed
    bl_ref: (NOUT, 1)
    qw_ref: (NOUT, 1)         Q weight column (Linear(1, noutputs)^T)
    out_ref:(1, tn)           lane-dense per-sample cross-section
    """
    x = x_ref[...]                      # (6, tn)
    mhh   = x[0:1, :]
    klam  = x[1:2, :]
    ct    = x[2:3, :]
    ctt   = x[3:4, :]
    cggh  = x[4:5, :]
    cgghh = x[5:6, :]

    # ---- P(mhh): Linear(1, nodes) + SiLU, 10x[Linear(nodes,nodes)+SiLU],
    #              Linear(nodes, noutputs)   (all feature-major: W^T @ h) ----
    # K=1 first layer is a pure outer product -> VPU broadcast multiply.
    h = w0_ref[...] * mhh + b0_ref[...]             # (NODES, tn)
    h = _silu(h)
    for i in range(NHIDDEN):                        # static unroll (10 iters)
        h = jnp.dot(wh_ref[i], h,
                    preferred_element_type=jnp.float32) + bh_ref[i]
        h = _silu(h)
    p = jnp.dot(wl_ref[...], h,
                preferred_element_type=jnp.float32) + bl_ref[...]   # (NOUT, tn)

    # ---- Q(mhh): Linear(1, noutputs, bias=False) as a broadcast multiply ----
    q = qw_ref[...] * mhh                           # (NOUT, tn)
    A = p * jnp.exp(q)                              # (NOUT, tn)

    # ---- Polynomial features, stacked along sublanes (lane-dense rows) ----
    ct2, ct3 = ct * ct, ct * ct * ct
    klam2 = klam * klam
    cggh2 = cggh * cggh
    C = jnp.concatenate([
        ct2 * ct2,                 # ct ** 4
        ctt * ctt,                 # ctt ** 2
        ct2 * klam2,               # ct**2 * klambda**2
        cggh2 * klam2,             # cggh**2 * klambda**2
        cgghh * cgghh,             # cgghh ** 2
        ctt * ct2,                 # ctt * ct**2
        klam * ct3,                # klambda * ct**3
        ct * klam * ctt,           # ct * klambda * ctt
        cggh * klam * ctt,         # cggh * klambda * ctt
        ctt * cgghh,               # ctt * cgghh
        cggh * klam * ct2,         # cggh * klambda * ct**2
        cgghh * ct2,               # cgghh * ct**2
        klam2 * cggh * ct,         # klambda**2 * cggh * ct
        cgghh * ct * klam,         # cgghh * ct * klambda
        cggh * cgghh * klam,       # cggh * cgghh * klambda
        ct3 * cggh,                # ct**3 * cggh
        ct * ctt * cggh,           # ct * ctt * cggh
        ct * cggh2 * klam,         # ct * cggh**2 * klambda
        ct * cggh * cgghh,         # ct * cggh * cgghh
        ct2 * cggh2,               # ct**2 * cggh**2
        ctt * cggh2,               # ctt * cggh**2
        cggh2 * cggh * klam,       # cggh**3 * klambda
        cggh2 * cgghh,             # cggh**2 * cgghh
    ], axis=0)                                      # (NOUT, tn)

    # Fused reduction over the 23 coefficients (XLU) -> lane-dense (1, tn) store.
    out_ref[...] = jnp.sum(C * A, axis=0, keepdims=True)


def _round_up(a, b):
    return (a + b - 1) // b * b


def heftnet_forward(x, params, *, tn=2048):
    """x: (N, 6) float32.  Returns xsec: (N,) float32."""
    w0, b0, wh, bh, wl, bl, qw = params
    N = x.shape[0]

    # Pick a lane-aligned tile; pad the batch up to a multiple of it.
    tn = max(128, min(tn, _round_up(N, 128)))
    n_pad = _round_up(N, tn)

    # Feature-major input, zero-padded rows are harmless (finite everywhere).
    xt = jnp.zeros((NFEAT, n_pad), x.dtype).at[:, :N].set(x.T)

    # Transposed (feature-major) weights; tiny one-time cost outside the kernel.
    w0c = w0.T                                   # (NODES, 1)
    b0c = b0.T                                   # (NODES, 1)
    whT = jnp.transpose(wh, (0, 2, 1))           # (NHIDDEN, NODES, NODES)
    bhT = jnp.transpose(bh, (0, 2, 1))           # (NHIDDEN, NODES, 1)
    wlT = wl.T                                   # (NOUT, NODES)
    blT = bl.T                                   # (NOUT, 1)
    qwc = qw.T                                   # (NOUT, 1)

    grid = (n_pad // tn,)
    out = pl.pallas_call(
        heftnet_kernel,
        out_shape=jax.ShapeDtypeStruct((1, n_pad), jnp.float32),
        grid=grid,
        in_specs=[
            pl.BlockSpec((NFEAT, tn), lambda i: (0, i)),                 # x tile
            pl.BlockSpec((NODES, 1), lambda i: (0, 0)),                  # W0^T
            pl.BlockSpec((NODES, 1), lambda i: (0, 0)),                  # b0^T
            pl.BlockSpec((NHIDDEN, NODES, NODES), lambda i: (0, 0, 0)),  # Wh^T
            pl.BlockSpec((NHIDDEN, NODES, 1), lambda i: (0, 0, 0)),      # bh^T
            pl.BlockSpec((NOUT, NODES), lambda i: (0, 0)),               # Wl^T
            pl.BlockSpec((NOUT, 1), lambda i: (0, 0)),                   # bl^T
            pl.BlockSpec((NOUT, 1), lambda i: (0, 0)),                   # Qw^T
        ],
        out_specs=pl.BlockSpec((1, tn), lambda i: (0, i)),
        compiler_params=pltpu.CompilerParams(
            dimension_semantics=("parallel",)),
    )(xt, w0c, b0c, whT, bhT, wlT, blT, qwc)
    return out[0, :N]


def init_params(key):
    """Deterministic params mimicking nn.Linear's U(-1/sqrt(fan_in), ...) init.

    Stored in standard (in, out) layout; the wrapper transposes for the kernel.
    """
    def linear(kw, kb, fan_in, fan_out):
        bound = 1.0 / math.sqrt(fan_in)
        w = jax.random.uniform(kw, (fan_in, fan_out), jnp.float32, -bound, bound)
        b = jax.random.uniform(kb, (1, fan_out), jnp.float32, -bound, bound)
        return w, b

    keys = jax.random.split(key, 2 * (NHIDDEN + 2) + 1)
    w0, b0 = linear(keys[0], keys[1], 1, NODES)
    wh_list, bh_list = [], []
    for i in range(NHIDDEN):
        w, b = linear(keys[2 + 2 * i], keys[3 + 2 * i], NODES, NODES)
        wh_list.append(w)
        bh_list.append(b)
    wh = jnp.stack(wh_list, axis=0)                  # (NHIDDEN, NODES, NODES)
    bh = jnp.stack(bh_list, axis=0)                  # (NHIDDEN, 1, NODES)
    wl, bl = linear(keys[2 + 2 * NHIDDEN], keys[3 + 2 * NHIDDEN], NODES, NOUT)
    # Q: Linear(1, noutputs, bias=False)
    qw = jax.random.uniform(keys[-1], (1, NOUT), jnp.float32, -1.0, 1.0)
    return (w0, b0, wh, bh, wl, bl, qw)


def heftnet_ref(x, params):
    """Pure-JAX reference (standard layout) for correctness checking."""
    w0, b0, wh, bh, wl, bl, qw = params
    mhh, klam, ct, ctt, cggh, cgghh = [x[:, i:i + 1] for i in range(NFEAT)]
    C = jnp.concatenate([
        ct ** 4, ctt ** 2, ct ** 2 * klam ** 2, cggh ** 2 * klam ** 2,
        cgghh ** 2, ctt * ct ** 2, klam * ct ** 3, ct * klam * ctt,
        cggh * klam * ctt, ctt * cgghh, cggh * klam * ct ** 2,
        cgghh * ct ** 2, klam ** 2 * cggh * ct, cgghh * ct * klam,
        cggh * cgghh * klam, ct ** 3 * cggh, ct * ctt * cggh,
        ct * cggh ** 2 * klam, ct * cggh * cgghh, ct ** 2 * cggh ** 2,
        ctt * cggh ** 2, cggh ** 3 * klam, cggh ** 2 * cgghh], axis=1)
    h = jax.nn.silu(mhh @ w0 + b0)
    for i in range(NHIDDEN):
        h = jax.nn.silu(h @ wh[i] + bh[i])
    p = h @ wl + bl
    A = p * jnp.exp(mhh @ qw)
    return jnp.sum(C * A, axis=1)


if __name__ == "__main__":
    key = jax.random.PRNGKey(0)
    k_param, k_x = jax.random.split(key)

    params = init_params(k_param)
    N = 500                               # non-multiple of 128 to exercise padding
    x = jax.random.normal(k_x, (N, NFEAT), dtype=jnp.float32)

    xsec = jax.block_until_ready(heftnet_forward(x, params, tn=128))
    ref = jax.block_until_ready(heftnet_ref(x, params))

    max_err = float(jnp.max(jnp.abs(xsec - ref)))
    scale = 1.0 + float(jnp.max(jnp.abs(ref)))
    # tanh-form SiLU is mathematically exact; only FP rounding differences remain.
    assert np.isfinite(max_err) and max_err < 1e-3 * scale + 1e-4, (max_err, scale)

    print("KERNEL_OK")
</pallas_src>

<mosaic_0001>
module attributes {stable_mosaic.version = 11 : i64} {
  func.func @heftnet_kernel(%arg0: i32, %arg1: memref<6x128xf32, #tpu.memory_space<vmem>>, %arg2: memref<32x1xf32, #tpu.memory_space<vmem>>, %arg3: memref<32x1xf32, #tpu.memory_space<vmem>>, %arg4: memref<10x32x32xf32, #tpu.memory_space<vmem>>, %arg5: memref<10x32x1xf32, #tpu.memory_space<vmem>>, %arg6: memref<23x32xf32, #tpu.memory_space<vmem>>, %arg7: memref<23x1xf32, #tpu.memory_space<vmem>>, %arg8: memref<23x1xf32, #tpu.memory_space<vmem>>, %arg9: memref<1x128xf32, #tpu.memory_space<vmem>>) attributes {dimension_semantics = [#tpu.dimension_semantics<parallel>], iteration_bounds = array<i64: 4>, scalar_prefetch = 0 : i64, scratch_operands = 0 : i64, tpu.core_type = #tpu.core_type<tc>, window_params = [{transform_indices = @transform_0, window_bounds = array<i64: 6, 128>}, {pipeline_mode = #tpu.pipeline_mode<synchronous>, transform_indices = @transform_1, window_bounds = array<i64: 32, 1>}, {pipeline_mode = #tpu.pipeline_mode<synchronous>, transform_indices = @transform_2, window_bounds = array<i64: 32, 1>}, {pipeline_mode = #tpu.pipeline_mode<synchronous>, transform_indices = @transform_3, window_bounds = array<i64: 10, 32, 32>}, {pipeline_mode = #tpu.pipeline_mode<synchronous>, transform_indices = @transform_4, window_bounds = array<i64: 10, 32, 1>}, {pipeline_mode = #tpu.pipeline_mode<synchronous>, transform_indices = @transform_5, window_bounds = array<i64: 23, 32>}, {pipeline_mode = #tpu.pipeline_mode<synchronous>, transform_indices = @transform_6, window_bounds = array<i64: 23, 1>}, {pipeline_mode = #tpu.pipeline_mode<synchronous>, transform_indices = @transform_7, window_bounds = array<i64: 23, 1>}, {transform_indices = @transform_8, window_bounds = array<i64: 1, 128>}]} {
    %c0 = arith.constant 0 : index
    %c0_0 = arith.constant 0 : index
    %0 = vector.load %arg1[%c0, %c0_0] : memref<6x128xf32, #tpu.memory_space<vmem>>, vector<6x128xf32>
    %1 = vector.extract_strided_slice %0 {offsets = [0, 0], sizes = [1, 128], strides = [1, 1]} : vector<6x128xf32> to vector<1x128xf32>
    %2 = vector.extract_strided_slice %0 {offsets = [1, 0], sizes = [1, 128], strides = [1, 1]} : vector<6x128xf32> to vector<1x128xf32>
    %3 = vector.extract_strided_slice %0 {offsets = [2, 0], sizes = [1, 128], strides = [1, 1]} : vector<6x128xf32> to vector<1x128xf32>
    %4 = vector.extract_strided_slice %0 {offsets = [3, 0], sizes = [1, 128], strides = [1, 1]} : vector<6x128xf32> to vector<1x128xf32>
    %5 = vector.extract_strided_slice %0 {offsets = [4, 0], sizes = [1, 128], strides = [1, 1]} : vector<6x128xf32> to vector<1x128xf32>
    %6 = vector.extract_strided_slice %0 {offsets = [5, 0], sizes = [1, 128], strides = [1, 1]} : vector<6x128xf32> to vector<1x128xf32>
    %c0_1 = arith.constant 0 : index
    %c0_2 = arith.constant 0 : index
    %7 = vector.load %arg2[%c0_1, %c0_2] : memref<32x1xf32, #tpu.memory_space<vmem>>, vector<32x1xf32>
    %8 = vector.broadcast %7 : vector<32x1xf32> to vector<32x128xf32>
    %9 = vector.broadcast %1 : vector<1x128xf32> to vector<32x128xf32>
    %10 = arith.mulf %8, %9 : vector<32x128xf32>
    %c0_3 = arith.constant 0 : index
    %c0_4 = arith.constant 0 : index
    %11 = vector.load %arg3[%c0_3, %c0_4] : memref<32x1xf32, #tpu.memory_space<vmem>>, vector<32x1xf32>
    %12 = vector.broadcast %11 : vector<32x1xf32> to vector<32x128xf32>
    %13 = arith.addf %10, %12 : vector<32x128xf32>
    %cst = arith.constant 5.000000e-01 : f32
    %14 = vector.broadcast %cst : f32 to vector<32x128xf32>
    %15 = arith.mulf %14, %13 : vector<32x128xf32>
    %cst_5 = arith.constant 5.000000e-01 : f32
    %16 = vector.broadcast %cst_5 : f32 to vector<32x128xf32>
    %17 = arith.mulf %16, %13 : vector<32x128xf32>
    %18 = math.tanh %17 : vector<32x128xf32>
    %cst_6 = arith.constant 1.000000e+00 : f32
    %19 = vector.broadcast %cst_6 : f32 to vector<32x128xf32>
    %20 = arith.addf %19, %18 : vector<32x128xf32>
    %21 = arith.mulf %15, %20 : vector<32x128xf32>
    %c0_7 = arith.constant 0 : index
    %c0_8 = arith.constant 0 : index
    %c0_9 = arith.constant 0 : index
    %22 = vector.load %arg4[%c0_7, %c0_8, %c0_9] : memref<10x32x32xf32, #tpu.memory_space<vmem>>, vector<1x32x32xf32>
    %23 = vector.shape_cast %22 : vector<1x32x32xf32> to vector<32x32xf32>
    %cst_10 = arith.constant dense<0.000000e+00> : vector<32x128xf32>
    %24 = tpu.matmul %23, %21, %cst_10 {dimension_numbers = #tpu.dot_dimension_numbers<[1], [0], [0], [1], [0, 0, 1, 1], [], []>} : vector<32x32xf32>, vector<32x128xf32>, vector<32x128xf32> -> vector<32x128xf32>
    %c0_11 = arith.constant 0 : index
    %c0_12 = arith.constant 0 : index
    %c0_13 = arith.constant 0 : index
    %25 = vector.load %arg5[%c0_11, %c0_12, %c0_13] : memref<10x32x1xf32, #tpu.memory_space<vmem>>, vector<1x32x1xf32>
    %26 = vector.shape_cast %25 : vector<1x32x1xf32> to vector<32x1xf32>
    %27 = vector.broadcast %26 : vector<32x1xf32> to vector<32x128xf32>
    %28 = arith.addf %24, %27 : vector<32x128xf32>
    %cst_14 = arith.constant 5.000000e-01 : f32
    %29 = vector.broadcast %cst_14 : f32 to vector<32x128xf32>
    %30 = arith.mulf %29, %28 : vector<32x128xf32>
    %cst_15 = arith.constant 5.000000e-01 : f32
    %31 = vector.broadcast %cst_15 : f32 to vector<32x128xf32>
    %32 = arith.mulf %31, %28 : vector<32x128xf32>
    %33 = math.tanh %32 : vector<32x128xf32>
    %cst_16 = arith.constant 1.000000e+00 : f32
    %34 = vector.broadcast %cst_16 : f32 to vector<32x128xf32>
    %35 = arith.addf %34, %33 : vector<32x128xf32>
    %36 = arith.mulf %30, %35 : vector<32x128xf32>
    %c1 = arith.constant 1 : index
    %c0_17 = arith.constant 0 : index
    %c0_18 = arith.constant 0 : index
    %37 = vector.load %arg4[%c1, %c0_17, %c0_18] : memref<10x32x32xf32, #tpu.memory_space<vmem>>, vector<1x32x32xf32>
    %38 = vector.shape_cast %37 : vector<1x32x32xf32> to vector<32x32xf32>
    %cst_19 = arith.constant dense<0.000000e+00> : vector<32x128xf32>
    %39 = tpu.matmul %38, %36, %cst_19 {dimension_numbers = #tpu.dot_dimension_numbers<[1], [0], [0], [1], [0, 0, 1, 1], [], []>} : vector<32x32xf32>, vector<32x128xf32>, vector<32x128xf32> -> vector<32x128xf32>
    %c1_20 = arith.constant 1 : index
    %c0_21 = arith.constant 0 : index
    %c0_22 = arith.constant 0 : index
    %40 = vector.load %arg5[%c1_20, %c0_21, %c0_22] : memref<10x32x1xf32, #tpu.memory_space<vmem>>, vector<1x32x1xf32>
    %41 = vector.shape_cast %40 : vector<1x32x1xf32> to vector<32x1xf32>
    %42 = vector.broadcast %41 : vector<32x1xf32> to vector<32x128xf32>
    %43 = arith.addf %39, %42 : vector<32x128xf32>
    %cst_23 = arith.constant 5.000000e-01 : f32
    %44 = vector.broadcast %cst_23 : f32 to vector<32x128xf32>
    %45 = arith.mulf %44, %43 : vector<32x128xf32>
    %cst_24 = arith.constant 5.000000e-01 : f32
    %46 = vector.broadcast %cst_24 : f32 to vector<32x128xf32>
    %47 = arith.mulf %46, %43 : vector<32x128xf32>
    %48 = math.tanh %47 : vector<32x128xf32>
    %cst_25 = arith.constant 1.000000e+00 : f32
    %49 = vector.broadcast %cst_25 : f32 to vector<32x128xf32>
    %50 = arith.addf %49, %48 : vector<32x128xf32>
    %51 = arith.mulf %45, %50 : vector<32x128xf32>
    %c2 = arith.constant 2 : index
    %c0_26 = arith.constant 0 : index
    %c0_27 = arith.constant 0 : index
    %52 = vector.load %arg4[%c2, %c0_26, %c0_27] : memref<10x32x32xf32, #tpu.memory_space<vmem>>, vector<1x32x32xf32>
    %53 = vector.shape_cast %52 : vector<1x32x32xf32> to vector<32x32xf32>
    %cst_28 = arith.constant dense<0.000000e+00> : vector<32x128xf32>
    %54 = tpu.matmul %53, %51, %cst_28 {dimension_numbers = #tpu.dot_dimension_numbers<[1], [0], [0], [1], [0, 0, 1, 1], [], []>} : vector<32x32xf32>, vector<32x128xf32>, vector<32x128xf32> -> vector<32x128xf32>
    %c2_29 = arith.constant 2 : index
    %c0_30 = arith.constant 0 : index
    %c0_31 = arith.constant 0 : index
    %55 = vector.load %arg5[%c2_29, %c0_30, %c0_31] : memref<10x32x1xf32, #tpu.memory_space<vmem>>, vector<1x32x1xf32>
    %56 = vector.shape_cast %55 : vector<1x32x1xf32> to vector<32x1xf32>
    %57 = vector.broadcast %56 : vector<32x1xf32> to vector<32x128xf32>
    %58 = arith.addf %54, %57 : vector<32x128xf32>
    %cst_32 = arith.constant 5.000000e-01 : f32
    %59 = vector.broadcast %cst_32 : f32 to vector<32x128xf32>
    %60 = arith.mulf %59, %58 : vector<32x128xf32>
    %cst_33 = arith.constant 5.000000e-01 : f32
    %61 = vector.broadcast %cst_33 : f32 to vector<32x128xf32>
    %62 = arith.mulf %61, %58 : vector<32x128xf32>
    %63 = math.tanh %62 : vector<32x128xf32>
    %cst_34 = arith.constant 1.000000e+00 : f32
    %64 = vector.broadcast %cst_34 : f32 to vector<32x128xf32>
    %65 = arith.addf %64, %63 : vector<32x128xf32>
    %66 = arith.mulf %60, %65 : vector<32x128xf32>
    %c3 = arith.constant 3 : index
    %c0_35 = arith.constant 0 : index
    %c0_36 = arith.constant 0 : index
    %67 = vector.load %arg4[%c3, %c0_35, %c0_36] : memref<10x32x32xf32, #tpu.memory_space<vmem>>, vector<1x32x32xf32>
    %68 = vector.shape_cast %67 : vector<1x32x32xf32> to vector<32x32xf32>
    %cst_37 = arith.constant dense<0.000000e+00> : vector<32x128xf32>
    %69 = tpu.matmul %68, %66, %cst_37 {dimension_numbers = #tpu.dot_dimension_numbers<[1], [0], [0], [1], [0, 0, 1, 1], [], []>} : vector<32x32xf32>, vector<32x128xf32>, vector<32x128xf32> -> vector<32x128xf32>
    %c3_38 = arith.constant 3 : index
    %c0_39 = arith.constant 0 : index
    %c0_40 = arith.constant 0 : index
    %70 = vector.load %arg5[%c3_38, %c0_39, %c0_40] : memref<10x32x1xf32, #tpu.memory_space<vmem>>, vector<1x32x1xf32>
    %71 = vector.shape_cast %70 : vector<1x32x1xf32> to vector<32x1xf32>
    %72 = vector.broadcast %71 : vector<32x1xf32> to vector<32x128xf32>
    %73 = arith.addf %69, %72 : vector<32x128xf32>
    %cst_41 = arith.constant 5.000000e-01 : f32
    %74 = vector.broadcast %cst_41 : f32 to vector<32x128xf32>
    %75 = arith.mulf %74, %73 : vector<32x128xf32>
    %cst_42 = arith.constant 5.000000e-01 : f32
    %76 = vector.broadcast %cst_42 : f32 to vector<32x128xf32>
    %77 = arith.mulf %76, %73 : vector<32x128xf32>
    %78 = math.tanh %77 : vector<32x128xf32>
    %cst_43 = arith.constant 1.000000e+00 : f32
    %79 = vector.broadcast %cst_43 : f32 to vector<32x128xf32>
    %80 = arith.addf %79, %78 : vector<32x128xf32>
    %81 = arith.mulf %75, %80 : vector<32x128xf32>
    %c4 = arith.constant 4 : index
    %c0_44 = arith.constant 0 : index
    %c0_45 = arith.constant 0 : index
    %82 = vector.load %arg4[%c4, %c0_44, %c0_45] : memref<10x32x32xf32, #tpu.memory_space<vmem>>, vector<1x32x32xf32>
    %83 = vector.shape_cast %82 : vector<1x32x32xf32> to vector<32x32xf32>
    %cst_46 = arith.constant dense<0.000000e+00> : vector<32x128xf32>
    %84 = tpu.matmul %83, %81, %cst_46 {dimension_numbers = #tpu.dot_dimension_numbers<[1], [0], [0], [1], [0, 0, 1, 1], [], []>} : vector<32x32xf32>, vector<32x128xf32>, vector<32x128xf32> -> vector<32x128xf32>
    %c4_47 = arith.constant 4 : index
    %c0_48 = arith.constant 0 : index
    %c0_49 = arith.constant 0 : index
    %85 = vector.load %arg5[%c4_47, %c0_48, %c0_49] : memref<10x32x1xf32, #tpu.memory_space<vmem>>, vector<1x32x1xf32>
    %86 = vector.shape_cast %85 : vector<1x32x1xf32> to vector<32x1xf32>
    %87 = vector.broadcast %86 : vector<32x1xf32> to vector<32x128xf32>
    %88 = arith.addf %84, %87 : vector<32x128xf32>
    %cst_50 = arith.constant 5.000000e-01 : f32
    %89 = vector.broadcast %cst_50 : f32 to vector<32x128xf32>
    %90 = arith.mulf %89, %88 : vector<32x128xf32>
    %cst_51 = arith.constant 5.000000e-01 : f32
    %91 = vector.broadcast %cst_51 : f32 to vector<32x128xf32>
    %92 = arith.mulf %91, %88 : vector<32x128xf32>
    %93 = math.tanh %92 : vector<32x128xf32>
    %cst_52 = arith.constant 1.000000e+00 : f32
    %94 = vector.broadcast %cst_52 : f32 to vector<32x128xf32>
    %95 = arith.addf %94, %93 : vector<32x128xf32>
    %96 = arith.mulf %90, %95 : vector<32x128xf32>
    %c5 = arith.constant 5 : index
    %c0_53 = arith.constant 0 : index
    %c0_54 = arith.constant 0 : index
    %97 = vector.load %arg4[%c5, %c0_53, %c0_54] : memref<10x32x32xf32, #tpu.memory_space<vmem>>, vector<1x32x32xf32>
    %98 = vector.shape_cast %97 : vector<1x32x32xf32> to vector<32x32xf32>
    %cst_55 = arith.constant dense<0.000000e+00> : vector<32x128xf32>
    %99 = tpu.matmul %98, %96, %cst_55 {dimension_numbers = #tpu.dot_dimension_numbers<[1], [0], [0], [1], [0, 0, 1, 1], [], []>} : vector<32x32xf32>, vector<32x128xf32>, vector<32x128xf32> -> vector<32x128xf32>
    %c5_56 = arith.constant 5 : index
    %c0_57 = arith.constant 0 : index
    %c0_58 = arith.constant 0 : index
    %100 = vector.load %arg5[%c5_56, %c0_57, %c0_58] : memref<10x32x1xf32, #tpu.memory_space<vmem>>, vector<1x32x1xf32>
    %101 = vector.shape_cast %100 : vector<1x32x1xf32> to vector<32x1xf32>
    %102 = vector.broadcast %101 : vector<32x1xf32> to vector<32x128xf32>
    %103 = arith.addf %99, %102 : vector<32x128xf32>
    %cst_59 = arith.constant 5.000000e-01 : f32
    %104 = vector.broadcast %cst_59 : f32 to vector<32x128xf32>
    %105 = arith.mulf %104, %103 : vector<32x128xf32>
    %cst_60 = arith.constant 5.000000e-01 : f32
    %106 = vector.broadcast %cst_60 : f32 to vector<32x128xf32>
    %107 = arith.mulf %106, %103 : vector<32x128xf32>
    %108 = math.tanh %107 : vector<32x128xf32>
    %cst_61 = arith.constant 1.000000e+00 : f32
    %109 = vector.broadcast %cst_61 : f32 to vector<32x128xf32>
    %110 = arith.addf %109, %108 : vector<32x128xf32>
    %111 = arith.mulf %105, %110 : vector<32x128xf32>
    %c6 = arith.constant 6 : index
    %c0_62 = arith.constant 0 : index
    %c0_63 = arith.constant 0 : index
    %112 = vector.load %arg4[%c6, %c0_62, %c0_63] : memref<10x32x32xf32, #tpu.memory_space<vmem>>, vector<1x32x32xf32>
    %113 = vector.shape_cast %112 : vector<1x32x32xf32> to vector<32x32xf32>
    %cst_64 = arith.constant dense<0.000000e+00> : vector<32x128xf32>
    %114 = tpu.matmul %113, %111, %cst_64 {dimension_numbers = #tpu.dot_dimension_numbers<[1], [0], [0], [1], [0, 0, 1, 1], [], []>} : vector<32x32xf32>, vector<32x128xf32>, vector<32x128xf32> -> vector<32x128xf32>
    %c6_65 = arith.constant 6 : index
    %c0_66 = arith.constant 0 : index
    %c0_67 = arith.constant 0 : index
    %115 = vector.load %arg5[%c6_65, %c0_66, %c0_67] : memref<10x32x1xf32, #tpu.memory_space<vmem>>, vector<1x32x1xf32>
    %116 = vector.shape_cast %115 : vector<1x32x1xf32> to vector<32x1xf32>
    %117 = vector.broadcast %116 : vector<32x1xf32> to vector<32x128xf32>
    %118 = arith.addf %114, %117 : vector<32x128xf32>
    %cst_68 = arith.constant 5.000000e-01 : f32
    %119 = vector.broadcast %cst_68 : f32 to vector<32x128xf32>
    %120 = arith.mulf %119, %118 : vector<32x128xf32>
    %cst_69 = arith.constant 5.000000e-01 : f32
    %121 = vector.broadcast %cst_69 : f32 to vector<32x128xf32>
    %122 = arith.mulf %121, %118 : vector<32x128xf32>
    %123 = math.tanh %122 : vector<32x128xf32>
    %cst_70 = arith.constant 1.000000e+00 : f32
    %124 = vector.broadcast %cst_70 : f32 to vector<32x128xf32>
    %125 = arith.addf %124, %123 : vector<32x128xf32>
    %126 = arith.mulf %120, %125 : vector<32x128xf32>
    %c7 = arith.constant 7 : index
    %c0_71 = arith.constant 0 : index
    %c0_72 = arith.constant 0 : index
    %127 = vector.load %arg4[%c7, %c0_71, %c0_72] : memref<10x32x32xf32, #tpu.memory_space<vmem>>, vector<1x32x32xf32>
    %128 = vector.shape_cast %127 : vector<1x32x32xf32> to vector<32x32xf32>
    %cst_73 = arith.constant dense<0.000000e+00> : vector<32x128xf32>
    %129 = tpu.matmul %128, %126, %cst_73 {dimension_numbers = #tpu.dot_dimension_numbers<[1], [0], [0], [1], [0, 0, 1, 1], [], []>} : vector<32x32xf32>, vector<32x128xf32>, vector<32x128xf32> -> vector<32x128xf32>
    %c7_74 = arith.constant 7 : index
    %c0_75 = arith.constant 0 : index
    %c0_76 = arith.constant 0 : index
    %130 = vector.load %arg5[%c7_74, %c0_75, %c0_76] : memref<10x32x1xf32, #tpu.memory_space<vmem>>, vector<1x32x1xf32>
    %131 = vector.shape_cast %130 : vector<1x32x1xf32> to vector<32x1xf32>
    %132 = vector.broadcast %131 : vector<32x1xf32> to vector<32x128xf32>
    %133 = arith.addf %129, %132 : vector<32x128xf32>
    %cst_77 = arith.constant 5.000000e-01 : f32
    %134 = vector.broadcast %cst_77 : f32 to vector<32x128xf32>
    %135 = arith.mulf %134, %133 : vector<32x128xf32>
    %cst_78 = arith.constant 5.000000e-01 : f32
    %136 = vector.broadcast %cst_78 : f32 to vector<32x128xf32>
    %137 = arith.mulf %136, %133 : vector<32x128xf32>
    %138 = math.tanh %137 : vector<32x128xf32>
    %cst_79 = arith.constant 1.000000e+00 : f32
    %139 = vector.broadcast %cst_79 : f32 to vector<32x128xf32>
    %140 = arith.addf %139, %138 : vector<32x128xf32>
    %141 = arith.mulf %135, %140 : vector<32x128xf32>
    %c8 = arith.constant 8 : index
    %c0_80 = arith.constant 0 : index
    %c0_81 = arith.constant 0 : index
    %142 = vector.load %arg4[%c8, %c0_80, %c0_81] : memref<10x32x32xf32, #tpu.memory_space<vmem>>, vector<1x32x32xf32>
    %143 = vector.shape_cast %142 : vector<1x32x32xf32> to vector<32x32xf32>
    %cst_82 = arith.constant dense<0.000000e+00> : vector<32x128xf32>
    %144 = tpu.matmul %143, %141, %cst_82 {dimension_numbers = #tpu.dot_dimension_numbers<[1], [0], [0], [1], [0, 0, 1, 1], [], []>} : vector<32x32xf32>, vector<32x128xf32>, vector<32x128xf32> -> vector<32x128xf32>
    %c8_83 = arith.constant 8 : index
    %c0_84 = arith.constant 0 : index
    %c0_85 = arith.constant 0 : index
    %145 = vector.load %arg5[%c8_83, %c0_84, %c0_85] : memref<10x32x1xf32, #tpu.memory_space<vmem>>, vector<1x32x1xf32>
    %146 = vector.shape_cast %145 : vector<1x32x1xf32> to vector<32x1xf32>
    %147 = vector.broadcast %146 : vector<32x1xf32> to vector<32x128xf32>
    %148 = arith.addf %144, %147 : vector<32x128xf32>
    %cst_86 = arith.constant 5.000000e-01 : f32
    %149 = vector.broadcast %cst_86 : f32 to vector<32x128xf32>
    %150 = arith.mulf %149, %148 : vector<32x128xf32>
    %cst_87 = arith.constant 5.000000e-01 : f32
    %151 = vector.broadcast %cst_87 : f32 to vector<32x128xf32>
    %152 = arith.mulf %151, %148 : vector<32x128xf32>
    %153 = math.tanh %152 : vector<32x128xf32>
    %cst_88 = arith.constant 1.000000e+00 : f32
    %154 = vector.broadcast %cst_88 : f32 to vector<32x128xf32>
    %155 = arith.addf %154, %153 : vector<32x128xf32>
    %156 = arith.mulf %150, %155 : vector<32x128xf32>
    %c9 = arith.constant 9 : index
    %c0_89 = arith.constant 0 : index
    %c0_90 = arith.constant 0 : index
    %157 = vector.load %arg4[%c9, %c0_89, %c0_90] : memref<10x32x32xf32, #tpu.memory_space<vmem>>, vector<1x32x32xf32>
    %158 = vector.shape_cast %157 : vector<1x32x32xf32> to vector<32x32xf32>
    %cst_91 = arith.constant dense<0.000000e+00> : vector<32x128xf32>
    %159 = tpu.matmul %158, %156, %cst_91 {dimension_numbers = #tpu.dot_dimension_numbers<[1], [0], [0], [1], [0, 0, 1, 1], [], []>} : vector<32x32xf32>, vector<32x128xf32>, vector<32x128xf32> -> vector<32x128xf32>
    %c9_92 = arith.constant 9 : index
    %c0_93 = arith.constant 0 : index
    %c0_94 = arith.constant 0 : index
    %160 = vector.load %arg5[%c9_92, %c0_93, %c0_94] : memref<10x32x1xf32, #tpu.memory_space<vmem>>, vector<1x32x1xf32>
    %161 = vector.shape_cast %160 : vector<1x32x1xf32> to vector<32x1xf32>
    %162 = vector.broadcast %161 : vector<32x1xf32> to vector<32x128xf32>
    %163 = arith.addf %159, %162 : vector<32x128xf32>
    %cst_95 = arith.constant 5.000000e-01 : f32
    %164 = vector.broadcast %cst_95 : f32 to vector<32x128xf32>
    %165 = arith.mulf %164, %163 : vector<32x128xf32>
    %cst_96 = arith.constant 5.000000e-01 : f32
    %166 = vector.broadcast %cst_96 : f32 to vector<32x128xf32>
    %167 = arith.mulf %166, %163 : vector<32x128xf32>
    %168 = math.tanh %167 : vector<32x128xf32>
    %cst_97 = arith.constant 1.000000e+00 : f32
    %169 = vector.broadcast %cst_97 : f32 to vector<32x128xf32>
    %170 = arith.addf %169, %168 : vector<32x128xf32>
    %171 = arith.mulf %165, %170 : vector<32x128xf32>
    %c0_98 = arith.constant 0 : index
    %c0_99 = arith.constant 0 : index
    %172 = vector.load %arg6[%c0_98, %c0_99] : memref<23x32xf32, #tpu.memory_space<vmem>>, vector<23x32xf32>
    %cst_100 = arith.constant dense<0.000000e+00> : vector<23x128xf32>
    %173 = tpu.matmul %172, %171, %cst_100 {dimension_numbers = #tpu.dot_dimension_numbers<[1], [0], [0], [1], [0, 0, 1, 1], [], []>} : vector<23x32xf32>, vector<32x128xf32>, vector<23x128xf32> -> vector<23x128xf32>
    %c0_101 = arith.constant 0 : index
    %c0_102 = arith.constant 0 : index
    %174 = vector.load %arg7[%c0_101, %c0_102] : memref<23x1xf32, #tpu.memory_space<vmem>>, vector<23x1xf32>
    %175 = vector.broadcast %174 : vector<23x1xf32> to vector<23x128xf32>
    %176 = arith.addf %173, %175 : vector<23x128xf32>
    %c0_103 = arith.constant 0 : index
    %c0_104 = arith.constant 0 : index
    %177 = vector.load %arg8[%c0_103, %c0_104] : memref<23x1xf32, #tpu.memory_space<vmem>>, vector<23x1xf32>
    %178 = vector.broadcast %177 : vector<23x1xf32> to vector<23x128xf32>
    %179 = vector.broadcast %1 : vector<1x128xf32> to vector<23x128xf32>
    %180 = arith.mulf %178, %179 : vector<23x128xf32>
    %181 = math.exp %180 : vector<23x128xf32>
    %182 = arith.mulf %176, %181 : vector<23x128xf32>
    %183 = arith.mulf %3, %3 : vector<1x128xf32>
    %184 = arith.mulf %3, %3 : vector<1x128xf32>
    %185 = arith.mulf %184, %3 : vector<1x128xf32>
    %186 = arith.mulf %2, %2 : vector<1x128xf32>
    %187 = arith.mulf %5, %5 : vector<1x128xf32>
    %188 = arith.mulf %183, %183 : vector<1x128xf32>
    %189 = arith.mulf %4, %4 : vector<1x128xf32>
    %190 = arith.mulf %183, %186 : vector<1x128xf32>
    %191 = arith.mulf %187, %186 : vector<1x128xf32>
    %192 = arith.mulf %6, %6 : vector<1x128xf32>
    %193 = arith.mulf %4, %183 : vector<1x128xf32>
    %194 = arith.mulf %2, %185 : vector<1x128xf32>
    %195 = arith.mulf %3, %2 : vector<1x128xf32>
    %196 = arith.mulf %195, %4 : vector<1x128xf32>
    %197 = arith.mulf %5, %2 : vector<1x128xf32>
    %198 = arith.mulf %197, %4 : vector<1x128xf32>
    %199 = arith.mulf %4, %6 : vector<1x128xf32>
    %200 = arith.mulf %5, %2 : vector<1x128xf32>
    %201 = arith.mulf %200, %183 : vector<1x128xf32>
    %202 = arith.mulf %6, %183 : vector<1x128xf32>
    %203 = arith.mulf %186, %5 : vector<1x128xf32>
    %204 = arith.mulf %203, %3 : vector<1x128xf32>
    %205 = arith.mulf %6, %3 : vector<1x128xf32>
    %206 = arith.mulf %205, %2 : vector<1x128xf32>
    %207 = arith.mulf %5, %6 : vector<1x128xf32>
    %208 = arith.mulf %207, %2 : vector<1x128xf32>
    %209 = arith.mulf %185, %5 : vector<1x128xf32>
    %210 = arith.mulf %3, %4 : vector<1x128xf32>
    %211 = arith.mulf %210, %5 : vector<1x128xf32>
    %212 = arith.mulf %3, %187 : vector<1x128xf32>
    %213 = arith.mulf %212, %2 : vector<1x128xf32>
    %214 = arith.mulf %3, %5 : vector<1x128xf32>
    %215 = arith.mulf %214, %6 : vector<1x128xf32>
    %216 = arith.mulf %183, %187 : vector<1x128xf32>
    %217 = arith.mulf %4, %187 : vector<1x128xf32>
    %218 = arith.mulf %187, %5 : vector<1x128xf32>
    %219 = arith.mulf %218, %2 : vector<1x128xf32>
    %220 = arith.mulf %187, %6 : vector<1x128xf32>
    %221 = tpu.concatenate %188, %189, %190, %191, %192, %193, %194, %196, %198, %199, %201, %202, %204, %206, %208, %209 in 0 : vector<1x128xf32>, vector<1x128xf32>, vector<1x128xf32>, vector<1x128xf32>, vector<1x128xf32>, vector<1x128xf32>, vector<1x128xf32>, vector<1x128xf32>, vector<1x128xf32>, vector<1x128xf32>, vector<1x128xf32>, vector<1x128xf32>, vector<1x128xf32>, vector<1x128xf32>, vector<1x128xf32>, vector<1x128xf32> -> vector<16x128xf32>
    %222 = tpu.concatenate %211, %213, %215, %216, %217, %219, %220 in 0 : vector<1x128xf32>, vector<1x128xf32>, vector<1x128xf32>, vector<1x128xf32>, vector<1x128xf32>, vector<1x128xf32>, vector<1x128xf32> -> vector<7x128xf32>
    %223 = tpu.concatenate %221, %222 in 0 : vector<16x128xf32>, vector<7x128xf32> -> vector<23x128xf32>
    %224 = arith.mulf %223, %182 : vector<23x128xf32>
    %cst_105 = arith.constant dense<0.000000e+00> : vector<128xf32>
    %225 = vector.multi_reduction <add>, %224, %cst_105 [0] : vector<23x128xf32> to vector<128xf32>
    %226 = vector.shape_cast %225 : vector<128xf32> to vector<1x128xf32>
    %c0_106 = arith.constant 0 : index
    %c0_107 = arith.constant 0 : index
    %227 = vector.load %arg9[%c0_106, %c0_107] : memref<1x128xf32, #tpu.memory_space<vmem>>, vector<1x128xf32>
    tpu.vector_store %arg9[%c0_106, %c0_107], %226 {strides = array<i32>} : memref<1x128xf32, #tpu.memory_space<vmem>>, vector<1x128xf32>,
    return
  }
  func.func @transform_0(%arg0: i32) -> (i32, i32) {
    %c0_i32 = arith.constant 0 : i32
    %c0_i32_0 = arith.constant 0 : i32
    return %c0_i32, %arg0 : i32, i32
  }
  func.func @transform_1(%arg0: i32) -> (i32, i32) {
    %c0_i32 = arith.constant 0 : i32
    %c0_i32_0 = arith.constant 0 : i32
    %c0_i32_1 = arith.constant 0 : i32
    return %c0_i32, %c0_i32_0 : i32, i32
  }
  func.func @transform_2(%arg0: i32) -> (i32, i32) {
    %c0_i32 = arith.constant 0 : i32
    %c0_i32_0 = arith.constant 0 : i32
    %c0_i32_1 = arith.constant 0 : i32
    return %c0_i32, %c0_i32_0 : i32, i32
  }
  func.func @transform_3(%arg0: i32) -> (i32, i32, i32) {
    %c0_i32 = arith.constant 0 : i32
    %c0_i32_0 = arith.constant 0 : i32
    %c0_i32_1 = arith.constant 0 : i32
    %c0_i32_2 = arith.constant 0 : i32
    return %c0_i32, %c0_i32_0, %c0_i32_1 : i32, i32, i32
  }
  func.func @transform_4(%arg0: i32) -> (i32, i32, i32) {
    %c0_i32 = arith.constant 0 : i32
    %c0_i32_0 = arith.constant 0 : i32
    %c0_i32_1 = arith.constant 0 : i32
    %c0_i32_2 = arith.constant 0 : i32
    return %c0_i32, %c0_i32_0, %c0_i32_1 : i32, i32, i32
  }
  func.func @transform_5(%arg0: i32) -> (i32, i32) {
    %c0_i32 = arith.constant 0 : i32
    %c0_i32_0 = arith.constant 0 : i32
    %c0_i32_1 = arith.constant 0 : i32
    return %c0_i32, %c0_i32_0 : i32, i32
  }
  func.func @transform_6(%arg0: i32) -> (i32, i32) {
    %c0_i32 = arith.constant 0 : i32
    %c0_i32_0 = arith.constant 0 : i32
    %c0_i32_1 = arith.constant 0 : i32
    return %c0_i32, %c0_i32_0 : i32, i32
  }
  func.func @transform_7(%arg0: i32) -> (i32, i32) {
    %c0_i32 = arith.constant 0 : i32
    %c0_i32_0 = arith.constant 0 : i32
    %c0_i32_1 = arith.constant 0 : i32
    return %c0_i32, %c0_i32_0 : i32, i32
  }
  func.func @transform_8(%arg0: i32) -> (i32, i32) {
    %c0_i32 = arith.constant 0 : i32
    %c0_i32_0 = arith.constant 0 : i32
    return %c0_i32, %arg0 : i32, i32
  }
}

</mosaic_0001>

<bundles_post_ra>
// kernel: tpu_custom_call.1
= control target key start
LH: loop header
LB: loop body
LE: loop exit
PB: predicated region body
PF: predicated region fallthrough
CT: control target
= control target key end

     0   :  { %13 = vsyncpa [#allocation3], 0  ;;  %s3397_s0 = inlined_call_operand.vmem [shape: f32[6,512], index: 0, kind: input, shape index: {}]   ;;  %s3398_s1 = inlined_call_operand.vmem [shape: f32[32,1], index: 1, kind: input, shape index: {}]   ;;  %s3399_s2 = inlined_call_operand.vmem [shape: f32[32,1], index: 2, kind: input, shape index: {}]   ;;  %s3400_s3 = inlined_call_operand.vmem [shape: f32[10,32,32], index: 3, kind: input, shape index: {}]   ;;  %s3401_s4 = inlined_call_operand.vmem [shape: f32[10,32,1], index: 4, kind: input, shape index: {}]   ;;  %s3402_s5 = inlined_call_operand.vmem [shape: f32[23,32], index: 5, kind: input, shape index: {}]   ;;  %s3403_s6 = inlined_call_operand.vmem [shape: f32[23,1], index: 6, kind: input, shape index: {}]   ;;  %s3404_s7 = inlined_call_operand.vmem [shape: f32[23,1], index: 7, kind: input, shape index: {}]   ;;  %s3405_s8 = inlined_call_operand.hbm [shape: f32[1,512], index: 8, kind: output, shape index: {}]  }
   0x1   :  { %15 = vsyncpa [#allocation3 + $0x1], 0  ;;  %s2870_s27 = smov 0   ;;  %s2872_s28 = smov 0  }
   0x2   :  { %s2874_s29 = smov 0   ;;  %s2876_s30 = smov 0  }
   0x3 LB: > { %s2891_s9 = sadd.s32 4294967295, %s2818_s30   ;;  %s2163_s10 = sadd.s32 4294967294, %s2818_s30   ;;  %s2818_s30 = sphi %s2876_s30, %s3411_s30   ;;  %s2814_s29 = sphi %s2874_s29, %s3410_s29   ;;  %s2810_s28 = sphi %s2872_s28, %s3409_s28   ;;  %s2806_s27 = sphi %s2870_s27, %s3408_s27  }
   0x4   : > { %s2895_s11 = sadd.s32 1, %s2818_s30   ;;  %s201_s12 = sadd.s32 1, %s2814_s29 }
   0x5   : > { %s198_s13 = ssub.s32 %s2818_s30, %s2895_s11  ;;  %p211_p0 = scmp.ne.s32.totalorder %s2814_s29, %s2810_s28 }
   0x6   : > { %p199_p1 = scmp.eq.s32.totalorder %s198_s13, 0  ;;  %p212_p2 = scmp.eq.s32.totalorder %s2891_s9, 3 }
   0x7   : > { %p217_p3 = scmp.ne.s32.totalorder %s2810_s28, %s2806_s27  ;;  %p218_p4 = scmp.eq.s32.totalorder %s2163_s10, 3 }
   0x8   : > { %s2906_s14 = scalar_select %p199_p1, %s2814_s29, %s201_s12  }
   0x9   : > { %p2908_p5 = por %p212_p2, %p211_p0  ;;  %p2912_p6 = por %p218_p4, %p217_p3 }
   0xa   : > { %p2166_p7 = scmp.ge.s32.totalorder %s2818_s30, 1  ;;  %p264_p8 = scmp.lt.s32.totalorder %s2818_s30, 5 }
   0xc   : > { %p265_p9 = pnand %p2166_p7, %p264_p8 }
   0xd   : > { %v333_v0 = vld [vmem:[%s3399_s2] sm:$0xff] (!%p265_p9)  ;;  %v2820_v2 = vmov (!%p265_p9), 0   ;;  %v334_v3 = vld [vmem:[%s3399_s2 + $0x8] sm:$0xff] (!%p265_p9)  ;;  %v304_v5 = vld [vmem:[%s3398_s1 + $0x18] sm:$0xff] (!%p265_p9)  ;;  %vm405_vm0 = vcmask (!%p265_p9), 261120   ;;  %p296_p10 = scmp.lt.s32.totalorder (!%p265_p9), %s2891_s9, 3  ;;  %v325_v56 = vlaneseq (!%p265_p9) }
   0xe   : > { %268 = sbr.rel (%p265_p9) target bundleno = 2855 (0xb27), region = 52  ;;  %v301_v1 = vld [vmem:[%s3398_s1] sm:$0xff] (!%p265_p9)  ;;  %2660 = vset.pattern.permute.xlu1 (!%p265_p9), %v2820_v2  ;;  %2659 = vset.pattern.permute.xlu0 (!%p265_p9), %v2820_v2  ;;  %v302_v4 = vld [vmem:[%s3398_s1 + $0x8] sm:$0xff] (!%p265_p9)  ;;  %v303_v6 = vld [vmem:[%s3398_s1 + $0x10] sm:$0xff] (!%p265_p9)  ;;  %vm2822_vm1 = vmmov (!%p265_p9), 0   ;;  %vm2037_vm2 = vcmask (!%p265_p9), 1040384  }
   0xf   : > { %339 = vperm.xlu1 (!%p265_p9), %2660, %v333_v0   ;;  %307 = vperm.xlu0 (!%p265_p9), %2659, %v301_v1   ;;  %v336_v7 = vld [vmem:[%s3399_s2 + $0x18] sm:$0xff] (!%p265_p9)  ;;  %v335_v8 = vld [vmem:[%s3399_s2 + $0x10] sm:$0xff] (!%p265_p9)  ;;  %v382_v9 = vld [vmem:[%s3401_s4 + $0x8] sm:$0xff] (!%p265_p9)  ;;  %v326_v57 = vshrl.u32 (!%p265_p9), %v325_v56, 7  ;;  %vm2039_vm3 = vcmask (!%p265_p9), 1041408   ;;  %vm2041_vm4 = vcmask (!%p265_p9), 1042432  }
  0x10   : > { %v381_v10 = vld [vmem:[%s3401_s4] sm:$0xff] (!%p265_p9)  ;;  %v384_v11 = vld [vmem:[%s3401_s4 + $0x18] sm:$0xff] (!%p265_p9)  ;;  %v383_v12 = vld [vmem:[%s3401_s4 + $0x10] sm:$0xff] (!%p265_p9)  ;;  %vm2043_vm5 = vcmask (!%p265_p9), 1043456   ;;  %vm2045_vm6 = vcmask (!%p265_p9), 1044480   ;;  %vm2047_vm7 = vcmask (!%p265_p9), 1045504  }
  0x11   : > { %v2177_v13 = vld [vmem:[%s3401_s4 + $0x28] sm:$0xff] (!%p265_p9)  ;;  %v2176_v14 = vld [vmem:[%s3401_s4 + $0x20] sm:$0xff] (!%p265_p9)  ;;  %v2179_v15 = vld [vmem:[%s3401_s4 + $0x38] sm:$0xff] (!%p265_p9)  ;;  %v327_v58 = vsub.s32 (!%p265_p9), 0, %v326_v57  ;;  %vm2049_vm8 = vcmask (!%p265_p9), 1046528   ;;  %s2283_s12 = sshll.u32 (!%p265_p9), %s2891_s9, 4 }
  0x12   : > { %v2178_v16 = vld [vmem:[%s3401_s4 + $0x30] sm:$0xff] (!%p265_p9)  ;;  %v2189_v17 = vld [vmem:[%s3401_s4 + $0x48] sm:$0xff] (!%p265_p9)  ;;  %v2188_v18 = vld [vmem:[%s3401_s4 + $0x40] sm:$0xff] (!%p265_p9)  ;;  %s3355_s20 = scalar_lea.hbm (!%p265_p9), %s3405_s8, %s2283_s12 }
  0x13   : > { %344 = vperm.xlu1 (!%p265_p9), %2660, %v334_v3   ;;  %312 = vperm.xlu0 (!%p265_p9), %2659, %v302_v4   ;;  %v2191_v19 = vld [vmem:[%s3401_s4 + $0x58] sm:$0xff] (!%p265_p9)  ;;  %v2190_v20 = vld [vmem:[%s3401_s4 + $0x50] sm:$0xff] (!%p265_p9)  ;;  %v377_v21 = vld [vmem:[%s3400_s3] sm:$0xff] (!%p265_p9) }
  0x14   : > { %v2201_v22 = vld [vmem:[%s3401_s4 + $0x68] sm:$0xff] (!%p265_p9)  ;;  %v2200_v23 = vld [vmem:[%s3401_s4 + $0x60] sm:$0xff] (!%p265_p9)  ;;  %2381 = vmatprep.mubr.msk.f32.mxu1 (!%p265_p9), %vm405_vm0, %v377_v21  ;;  %v2203_v24 = vld [vmem:[%s3401_s4 + $0x78] sm:$0xff] (!%p265_p9) }
  0x15   : > { %v2202_v25 = vld [vmem:[%s3401_s4 + $0x70] sm:$0xff]  ;;  %v2213_v26 = vld [vmem:[%s3401_s4 + $0x88] sm:$0xff]  ;;  %v2212_v27 = vld [vmem:[%s3401_s4 + $0x80] sm:$0xff]  ;;  %s297_s23 = scalar_select %p296_p10, %s2891_s9, 3 }
  0x16   : > { %v2215_v28 = vld [vmem:[%s3401_s4 + $0x98] sm:$0xff]  ;;  %v2214_v29 = vld [vmem:[%s3401_s4 + $0x90] sm:$0xff]  ;;  %v2225_v30 = vld [vmem:[%s3401_s4 + $0xa8] sm:$0xff]  ;;  %s2824_s9 = smov [#allocation2]  }
  0x17   : > { %322 = vperm.xlu1 %2660, %v304_v5   ;;  %317 = vperm.xlu0 %2659, %v303_v6   ;;  %v2224_v31 = vld [vmem:[%s3401_s4 + $0xa0] sm:$0xff]  ;;  %v2227_v32 = vld [vmem:[%s3401_s4 + $0xb8] sm:$0xff]  ;;  %v2226_v33 = vld [vmem:[%s3401_s4 + $0xb0] sm:$0xff]  ;;  %s2167_s24 = sshll.u32 %s297_s23, 3  ;;  %s2760_s23 = sshll.u32 %s2824_s9, 4  ;;  %s2761_s23 = int_to_ptr.vmem [resolvable:$false] %s2760_s23 }
  0x18   : > { %v2237_v34 = vld [vmem:[%s3401_s4 + $0xc8] sm:$0xff]  ;;  %v2236_v35 = vld [vmem:[%s3401_s4 + $0xc0] sm:$0xff]  ;;  %v2239_v36 = vld [vmem:[%s3401_s4 + $0xd8] sm:$0xff]  ;;  %s3089_s10 = scalar_lea.vmem %s3397_s0, %s2167_s24  ;;  %s2762_s24 = scalar_lea.vmem %s2761_s23, 32 }
  0x19   : > { %v2238_v37 = vld [vmem:[%s3401_s4 + $0xd0] sm:$0xff]  ;;  %v2249_v38 = vld [vmem:[%s3401_s4 + $0xe8] sm:$0xff]  ;;  %v2248_v39 = vld [vmem:[%s3401_s4 + $0xe0] sm:$0xff] }
  0x1a   : > { %v2251_v40 = vld [vmem:[%s3401_s4 + $0xf8] sm:$0xff]  ;;  %v2250_v41 = vld [vmem:[%s3401_s4 + $0xf0] sm:$0xff]  ;;  %v2261_v42 = vld [vmem:[%s3401_s4 + $0x108] sm:$0xff] }
  0x1b   : > { %354 = vperm.xlu1 %2660, %v336_v7   ;;  %349 = vperm.xlu0 %2659, %v335_v8   ;;  %v2260_v43 = vld [vmem:[%s3401_s4 + $0x100] sm:$0xff]  ;;  %v2263_v44 = vld [vmem:[%s3401_s4 + $0x118] sm:$0xff]  ;;  %v2262_v45 = vld [vmem:[%s3401_s4 + $0x110] sm:$0xff] }
  0x1c   : > { %v2273_v46 = vld [vmem:[%s3401_s4 + $0x128] sm:$0xff]  ;;  %v2272_v47 = vld [vmem:[%s3401_s4 + $0x120] sm:$0xff]  ;;  %v2275_v48 = vld [vmem:[%s3401_s4 + $0x138] sm:$0xff] }
  0x1d   : > { %v2274_v49 = vld [vmem:[%s3401_s4 + $0x130] sm:$0xff]  ;;  %v1917_v50 = vld [vmem:[%s3404_s7 + $0x8] sm:$0xff]  ;;  %v1916_v51 = vld [vmem:[%s3404_s7] sm:$0xff] }
  0x1e   : > { %v1809_v52 = vld [vmem:[%s3403_s6] sm:$0xff]  ;;  %v1918_v53 = vld [vmem:[%s3404_s7 + $0x10] sm:$0x7f]  ;;  %v1810_v55 = vld [vmem:[%s3403_s6 + $0x8] sm:$0xff] }
  0x1f   : > { %392 = vperm.xlu1 %2660, %v382_v9   ;;  %387 = vperm.xlu0 %2659, %v381_v10   ;;  %v1811_v54 = vld [vmem:[%s3403_s6 + $0x10] sm:$0x7f]  ;;  %v300_v59 = vld [vmem:[%s3089_s10] sm:$0x3f] }
  0x20   : > { %v3092_v60 = vrot.slane %v300_v59, %v327_v58 }
  0x23   : > { %402 = vperm.xlu1 %2660, %v384_v11   ;;  %397 = vperm.xlu0 %2659, %v383_v12  }
  0x27   : > { %536 = vperm.xlu1 %2660, %v2177_v13   ;;  %531 = vperm.xlu0 %2659, %v2176_v14  }
  0x2b   : > { %546 = vperm.xlu1 %2660, %v2179_v15   ;;  %541 = vperm.xlu0 %2659, %v2178_v16  }
  0x2f   : > { %679 = vperm.xlu1 %2660, %v2189_v17   ;;  %674 = vperm.xlu0 %2659, %v2188_v18  }
  0x33   : > { %689 = vperm.xlu1 %2660, %v2191_v19   ;;  %684 = vperm.xlu0 %2659, %v2190_v20  }
  0x37   : > { %822 = vperm.xlu1 %2660, %v2201_v22   ;;  %817 = vperm.xlu0 %2659, %v2200_v23  }
  0x3b   : > { %832 = vperm.xlu1 %2660, %v2203_v24   ;;  %827 = vperm.xlu0 %2659, %v2202_v25  }
  0x3f   : > { %965 = vperm.xlu1 %2660, %v2213_v26   ;;  %960 = vperm.xlu0 %2659, %v2212_v27  }
  0x43   : > { %975 = vperm.xlu1 %2660, %v2215_v28   ;;  %970 = vperm.xlu0 %2659, %v2214_v29  }
  0x47   : > { %1108 = vperm.xlu1 %2660, %v2225_v30   ;;  %1103 = vperm.xlu0 %2659, %v2224_v31   ;;  %v378_v31 = vld [vmem:[%s3400_s3 + $0x8] sm:$0xff] }
  0x4b   : > { %1118 = vperm.xlu1 %2660, %v2227_v32   ;;  %1113 = vperm.xlu0 %2659, %v2226_v33   ;;  %v379_v32 = vld [vmem:[%s3400_s3 + $0x10] sm:$0xff]  ;;  %v380_v33 = vld [vmem:[%s3400_s3 + $0x18] sm:$0xff] }
  0x4f   : > { %1251 = vperm.xlu1 %2660, %v2237_v34   ;;  %1246 = vperm.xlu0 %2659, %v2236_v35   ;;  %v2172_v34 = vld [vmem:[%s3400_s3 + $0x20] sm:$0xff] }
  0x53   : > { %1261 = vperm.xlu1 %2660, %v2239_v36   ;;  %1256 = vperm.xlu0 %2659, %v2238_v37  }
  0x57   : > { %1394 = vperm.xlu1 %2660, %v2249_v38   ;;  %1389 = vperm.xlu0 %2659, %v2248_v39  }
  0x5b   : > { %1404 = vperm.xlu1 %2660, %v2251_v40   ;;  %1399 = vperm.xlu0 %2659, %v2250_v41  }
  0x5f   : > { %1537 = vperm.xlu1 %2660, %v2261_v42   ;;  %1532 = vperm.xlu0 %2659, %v2260_v43  }
  0x63   : > { %1547 = vperm.xlu1 %2660, %v2263_v44   ;;  %1542 = vperm.xlu0 %2659, %v2262_v45  }
  0x67   : > { %1680 = vperm.xlu1 %2660, %v2273_v46   ;;  %1675 = vperm.xlu0 %2659, %v2272_v47  }
  0x6b   : > { %1690 = vperm.xlu1 %2660, %v2275_v48   ;;  %1685 = vperm.xlu0 %2659, %v2274_v49  }
  0x6f   : > { %1926 = vperm.xlu1 %2660, %v1917_v50   ;;  %1921 = vperm.xlu0 %2659, %v1916_v51  }
  0x73   : > { %1814 = vperm.xlu1 %2660, %v1809_v52   ;;  %1931 = vperm.xlu0 %2659, %v1918_v53  }
  0x77   : > { %1824 = vperm.xlu1 %2660, %v1811_v54   ;;  %1819 = vperm.xlu0 %2659, %v1810_v55  }
  0x8e   : > { %v340_v61 = vpop.permute.xlu1 %339  ;;  %v308_v62 = vpop.permute.xlu0 %307 }
  0x8f   : > { %v329_v63 = vmul.f32 %v3092_v60, %v308_v62 }
  0x91   : > { %v357_v0 = vadd.f32 %v340_v61, %v329_v63 }
  0x92   : > { %v345_v1 = vpop.permute.xlu1 %344  ;;  %v313_v2 = vpop.permute.xlu0 %312 }
  0x93   : > { %v361_v3 = vmul.f32 0.5, %v357_v0  ;;  %v330_v4 = vmul.f32 %v3092_v60, %v313_v2  ;;  %v2173_v2 = vld [vmem:[%s3400_s3 + $0x28] sm:$0xff] }
  0x95   : > { %2661 = vtanh.f32 %v361_v3  ;;  %v358_v5 = vadd.f32 %v345_v1, %v330_v4  ;;  %v2175_v4 = vld [vmem:[%s3400_s3 + $0x38] sm:$0xff] }
  0x96   : > { %v323_v6 = vpop.permute.xlu1 %322  ;;  %v318_v7 = vpop.permute.xlu0 %317 }
  0x97   : > { %v362_v8 = vmul.f32 0.5, %v358_v5  ;;  %v332_v9 = vmul.f32 %v3092_v60, %v323_v6  ;;  %v331_v10 = vmul.f32 %v3092_v60, %v318_v7  ;;  %v2184_v5 = vld [vmem:[%s3400_s3 + $0x40] sm:$0xff] }
  0x98   : > { %2409 = vmatprep.mubr.msk.f32.mxu0 %vm405_vm0, %v2184_v5 }
  0x99   : > { %2663 = vtanh.f32 %v362_v8 }
  0x9a   : > { %v355_v11 = vpop.permute.xlu1 %354  ;;  %v350_v12 = vpop.permute.xlu0 %349 }
  0x9b   : > { %v360_v13 = vadd.f32 %v355_v11, %v332_v9  ;;  %v359_v14 = vadd.f32 %v350_v12, %v331_v10 }
  0x9d   : > { %v364_v15 = vmul.f32 0.5, %v360_v13  ;;  %v363_v16 = vmul.f32 0.5, %v359_v14 }
  0x9e   : > { %v393_v35 = vpop.permute.xlu1 %392  ;;  %v388_v36 = vpop.permute.xlu0 %387 }
  0x9f   : > { %v2662_v17 = vpop.eup %2661  ;;  %2665 = vtanh.f32 %v364_v15 }
  0xa0   : > { %2667 = vtanh.f32 %v363_v16  ;;  %v369_v18 = vadd.f32 1.0, %v2662_v17 }
  0xa2   : > { %v373_v21 = vmul.f32 %v369_v18, %v361_v3  ;;  %v403_v42 = vpop.permute.xlu1 %402  ;;  %v398_v45 = vpop.permute.xlu0 %397  ;;  %v2174_v3 = vld [vmem:[%s3400_s3 + $0x30] sm:$0xff] }
  0xa3   : > { %v2664_v19 = vpop.eup %2663 }
  0xa4   : > { %v370_v20 = vadd.f32 1.0, %v2664_v19 }
  0xa6   : > { %v374_v22 = vmul.f32 %v370_v20, %v362_v8  ;;  %v537_v6 = vpop.permute.xlu1 %536  ;;  %v532_v7 = vpop.permute.xlu0 %531 }
  0xa8   : > { %v2530_v23 = vpack.c.bf16 %v374_v22, %v373_v21 }
  0xa9   : > { %v2666_v24 = vpop.eup %2665 }
  0xaa   : > { %v2668_v25 = vpop.eup %2667  ;;  %v372_v26 = vadd.f32 1.0, %v2666_v24  ;;  %2531 = vmatprep.subr.bf16.mxu1 %v2530_v23  ;;  %v547_v13 = vpop.permute.xlu1 %546 }
  0xab   : > { %v371_v27 = vadd.f32 1.0, %v2668_v25  ;;  %2533 = vmatpush3.bf16.msra.mxu1 %v2530_v23 }
  0xac   : > { %v376_v28 = vmul.f32 %v372_v26, %v364_v15 }
  0xad   : > { %v375_v29 = vmul.f32 %v371_v27, %v363_v16  ;;  %v542_v16 = vpop.permute.xlu0 %541 }
  0xaf   : > { %v2534_v30 = vpack.c.bf16 %v376_v28, %v375_v29 }
  0xb1   : > { %2535 = vmatprep.subr.bf16.mxu1 %v2534_v30 }
  0xb2   : > { %2537 = vmatpush3.bf16.msra.mxu1 %v2534_v30 }
  0xb5   : > { %2382 = vmatmul.mubr.msk.f32.vlgmr.msra.gmra.mrb[0].mxu1 %vm405_vm0, %v378_v31 }
  0xb6   : > { %2384 = vmatprep.mubr.msk.f32.mxu1 %vm405_vm0, %v379_v32 }
  0xb9   : > { %2385 = vmatmul.mubr.msk.f32.gmra.mrb[2].mxu1 %vm405_vm0, %v380_v33 }
  0xba   : > { %2395 = vmatprep.mubr.msk.f32.mxu1 %vm405_vm0, %v2172_v34 }
 0x188   : > { %v2383_v37 = vpop.f32.mrb[0].mxu1 }
 0x189   : > { %v490_v38 = vadd.f32 %v2383_v37, %v393_v35  ;;  %v484_v39 = vpop.f32.mrb[1].mxu1  ;;  %v2186_v37 = vld [vmem:[%s3400_s3 + $0x50] sm:$0xff] }
 0x18a   : > { %v485_v40 = vadd.f32 %v484_v39, %v388_v36  ;;  %v2185_v36 = vld [vmem:[%s3400_s3 + $0x48] sm:$0xff]  ;;  %v2196_v39 = vld [vmem:[%s3400_s3 + $0x60] sm:$0xff] }
 0x18b   : > { %v504_v41 = vmul.f32 0.5, %v490_v38  ;;  %v2187_v38 = vld [vmem:[%s3400_s3 + $0x58] sm:$0xff] }
 0x18c   : > { %v503_v43 = vmul.f32 0.5, %v485_v40  ;;  %v2386_v44 = vpop.f32.mrb[2].mxu1  ;;  %v680_v40 = vpop.permute.xlu1 %679 }
 0x18d   : > { %2669 = vtanh.f32 %v504_v41  ;;  %v500_v46 = vadd.f32 %v2386_v44, %v403_v42  ;;  %v494_v47 = vpop.f32.mrb[3].mxu1 }
 0x18e   : > { %2671 = vtanh.f32 %v503_v43  ;;  %v495_v48 = vadd.f32 %v494_v47, %v398_v45 }
 0x18f   : > { %v506_v49 = vmul.f32 0.5, %v500_v46 }
 0x190   : > { %v505_v50 = vmul.f32 0.5, %v495_v48  ;;  %v690_v47 = vpop.permute.xlu1 %689 }
 0x191   : > { %2673 = vtanh.f32 %v506_v49 }
 0x192   : > { %2675 = vtanh.f32 %v505_v50 }
 0x197   : > { %v2670_v51 = vpop.eup %2669 }
 0x198   : > { %v2672_v52 = vpop.eup %2671  ;;  %v512_v53 = vadd.f32 1.0, %v2670_v51 }
 0x199   : > { %v511_v54 = vadd.f32 1.0, %v2672_v52 }
 0x19a   : > { %v516_v55 = vmul.f32 %v512_v53, %v504_v41  ;;  %v675_v41 = vpop.permute.xlu0 %674 }
 0x19b   : > { %v2674_v56 = vpop.eup %2673  ;;  %v515_v57 = vmul.f32 %v511_v54, %v503_v43 }
 0x19c   : > { %v2676_v58 = vpop.eup %2675  ;;  %v514_v59 = vadd.f32 1.0, %v2674_v56 }
 0x19d   : > { %v513_v61 = vadd.f32 1.0, %v2676_v58  ;;  %v2538_v62 = vpack.c.bf16 %v516_v55, %v515_v57 }
 0x19e   : > { %v518_v63 = vmul.f32 %v514_v59, %v506_v49 }
 0x19f   : > { %v517_v0 = vmul.f32 %v513_v61, %v505_v50  ;;  %2539 = vmatprep.subr.bf16.mxu1 %v2538_v62  ;;  %v685_v50 = vpop.permute.xlu0 %684 }
 0x1a0   : > { %2541 = vmatpush3.bf16.msra.mxu1 %v2538_v62 }
 0x1a1   : > { %v2542_v1 = vpack.c.bf16 %v518_v63, %v517_v0 }
 0x1a3   : > { %2543 = vmatprep.subr.bf16.mxu1 %v2542_v1 }
 0x1a4   : > { %2545 = vmatpush3.bf16.msra.mxu1 %v2542_v1 }
 0x1a7   : > { %2396 = vmatmul.mubr.msk.f32.vlgmr.msra.gmra.mrb[4].mxu1 %vm405_vm0, %v2173_v2 }
 0x1a8   : > { %2398 = vmatprep.mubr.msk.f32.mxu1 %vm405_vm0, %v2174_v3 }
 0x1ab   : > { %2399 = vmatmul.mubr.msk.f32.gmra.mrb[6].mxu1 %vm405_vm0, %v2175_v4 }
 0x1ac   : > { %2423 = vmatprep.mubr.msk.f32.mxu1 %vm405_vm0, %v2196_v39 }
 0x27a   : > { %v2397_v8 = vpop.f32.mrb[4].mxu1 }
 0x27b   : > { %v633_v9 = vadd.f32 %v2397_v8, %v537_v6  ;;  %v627_v10 = vpop.f32.mrb[5].mxu1  ;;  %v2198_v8 = vld [vmem:[%s3400_s3 + $0x70] sm:$0xff] }
 0x27c   : > { %v628_v11 = vadd.f32 %v627_v10, %v532_v7  ;;  %v2197_v7 = vld [vmem:[%s3400_s3 + $0x68] sm:$0xff]  ;;  %v2208_v10 = vld [vmem:[%s3400_s3 + $0x80] sm:$0xff] }
 0x27d   : > { %v647_v12 = vmul.f32 0.5, %v633_v9  ;;  %v2199_v9 = vld [vmem:[%s3400_s3 + $0x78] sm:$0xff] }
 0x27e   : > { %v646_v14 = vmul.f32 0.5, %v628_v11  ;;  %v2400_v15 = vpop.f32.mrb[6].mxu1  ;;  %v823_v11 = vpop.permute.xlu1 %822 }
 0x27f   : > { %2677 = vtanh.f32 %v647_v12  ;;  %v643_v17 = vadd.f32 %v2400_v15, %v547_v13  ;;  %v637_v18 = vpop.f32.mrb[7].mxu1 }
 0x280   : > { %2679 = vtanh.f32 %v646_v14  ;;  %v638_v19 = vadd.f32 %v637_v18, %v542_v16 }
 0x281   : > { %v649_v20 = vmul.f32 0.5, %v643_v17 }
 0x282   : > { %v648_v21 = vmul.f32 0.5, %v638_v19  ;;  %v833_v18 = vpop.permute.xlu1 %832 }
 0x283   : > { %2681 = vtanh.f32 %v649_v20 }
 0x284   : > { %2683 = vtanh.f32 %v648_v21 }
 0x289   : > { %v2678_v22 = vpop.eup %2677 }
 0x28a   : > { %v2680_v23 = vpop.eup %2679  ;;  %v655_v24 = vadd.f32 1.0, %v2678_v22 }
 0x28b   : > { %v654_v25 = vadd.f32 1.0, %v2680_v23 }
 0x28c   : > { %v659_v26 = vmul.f32 %v655_v24, %v647_v12  ;;  %v818_v12 = vpop.permute.xlu0 %817 }
 0x28d   : > { %v2682_v27 = vpop.eup %2681  ;;  %v658_v28 = vmul.f32 %v654_v25, %v646_v14 }
 0x28e   : > { %v2684_v29 = vpop.eup %2683  ;;  %v657_v30 = vadd.f32 1.0, %v2682_v27 }
 0x28f   : > { %v656_v31 = vadd.f32 1.0, %v2684_v29  ;;  %v2546_v32 = vpack.c.bf16 %v659_v26, %v658_v28 }
 0x290   : > { %v661_v33 = vmul.f32 %v657_v30, %v649_v20 }
 0x291   : > { %v660_v34 = vmul.f32 %v656_v31, %v648_v21  ;;  %2547 = vmatprep.subr.bf16.mxu0 %v2546_v32  ;;  %v828_v21 = vpop.permute.xlu0 %827 }
 0x292   : > { %2549 = vmatpush3.bf16.msra.mxu0 %v2546_v32 }
 0x293   : > { %v2550_v35 = vpack.c.bf16 %v661_v33, %v660_v34 }
 0x295   : > { %2551 = vmatprep.subr.bf16.mxu0 %v2550_v35 }
 0x296   : > { %2553 = vmatpush3.bf16.msra.mxu0 %v2550_v35 }
 0x299   : > { %2410 = vmatmul.mubr.msk.f32.vlgmr.msra.gmra.mrb[0].mxu0 %vm405_vm0, %v2185_v36 }
 0x29a   : > { %2412 = vmatprep.mubr.msk.f32.mxu0 %vm405_vm0, %v2186_v37 }
 0x29d   : > { %2413 = vmatmul.mubr.msk.f32.gmra.mrb[2].mxu0 %vm405_vm0, %v2187_v38 }
 0x29e   : > { %2437 = vmatprep.mubr.msk.f32.mxu0 %vm405_vm0, %v2208_v10 }
 0x36c   : > { %v2411_v42 = vpop.f32.mrb[0].mxu0 }
 0x36d   : > { %v776_v43 = vadd.f32 %v2411_v42, %v680_v40  ;;  %v770_v44 = vpop.f32.mrb[1].mxu0  ;;  %v2210_v42 = vld [vmem:[%s3400_s3 + $0x90] sm:$0xff] }
 0x36e   : > { %v771_v45 = vadd.f32 %v770_v44, %v675_v41  ;;  %v2209_v41 = vld [vmem:[%s3400_s3 + $0x88] sm:$0xff]  ;;  %v2220_v44 = vld [vmem:[%s3400_s3 + $0xa0] sm:$0xff] }
 0x36f   : > { %v790_v46 = vmul.f32 0.5, %v776_v43  ;;  %v2211_v43 = vld [vmem:[%s3400_s3 + $0x98] sm:$0xff] }
 0x370   : > { %v789_v48 = vmul.f32 0.5, %v771_v45  ;;  %v2414_v49 = vpop.f32.mrb[2].mxu0  ;;  %v966_v45 = vpop.permute.xlu1 %965 }
 0x371   : > { %2685 = vtanh.f32 %v790_v46  ;;  %v786_v51 = vadd.f32 %v2414_v49, %v690_v47  ;;  %v780_v52 = vpop.f32.mrb[3].mxu0 }
 0x372   : > { %2687 = vtanh.f32 %v789_v48  ;;  %v781_v53 = vadd.f32 %v780_v52, %v685_v50 }
 0x373   : > { %v792_v54 = vmul.f32 0.5, %v786_v51 }
 0x374   : > { %v791_v55 = vmul.f32 0.5, %v781_v53  ;;  %v976_v52 = vpop.permute.xlu1 %975 }
 0x375   : > { %2689 = vtanh.f32 %v792_v54 }
 0x376   : > { %2691 = vtanh.f32 %v791_v55 }
 0x37b   : > { %v2686_v56 = vpop.eup %2685 }
 0x37c   : > { %v2688_v57 = vpop.eup %2687  ;;  %v798_v58 = vadd.f32 1.0, %v2686_v56 }
 0x37d   : > { %v797_v59 = vadd.f32 1.0, %v2688_v57 }
 0x37e   : > { %v802_v61 = vmul.f32 %v798_v58, %v790_v46  ;;  %v961_v46 = vpop.permute.xlu0 %960 }
 0x37f   : > { %v2690_v62 = vpop.eup %2689  ;;  %v801_v63 = vmul.f32 %v797_v59, %v789_v48 }
 0x380   : > { %v2692_v0 = vpop.eup %2691  ;;  %v800_v1 = vadd.f32 1.0, %v2690_v62 }
 0x381   : > { %v799_v2 = vadd.f32 1.0, %v2692_v0  ;;  %v2554_v3 = vpack.c.bf16 %v802_v61, %v801_v63 }
 0x382   : > { %v804_v4 = vmul.f32 %v800_v1, %v792_v54 }
 0x383   : > { %v803_v5 = vmul.f32 %v799_v2, %v791_v55  ;;  %2555 = vmatprep.subr.bf16.mxu1 %v2554_v3  ;;  %v971_v55 = vpop.permute.xlu0 %970 }
 0x384   : > { %2557 = vmatpush3.bf16.msra.mxu1 %v2554_v3 }
 0x385   : > { %v2558_v6 = vpack.c.bf16 %v804_v4, %v803_v5 }
 0x387   : > { %2559 = vmatprep.subr.bf16.mxu1 %v2558_v6 }
 0x388   : > { %2561 = vmatpush3.bf16.msra.mxu1 %v2558_v6 }
 0x38b   : > { %2424 = vmatmul.mubr.msk.f32.vlgmr.msra.gmra.mrb[8].mxu1 %vm405_vm0, %v2197_v7 }
 0x38c   : > { %2426 = vmatprep.mubr.msk.f32.mxu1 %vm405_vm0, %v2198_v8 }
 0x38f   : > { %2427 = vmatmul.mubr.msk.f32.gmra.mrb[10].mxu1 %vm405_vm0, %v2199_v9 }
 0x390   : > { %2451 = vmatprep.mubr.msk.f32.mxu1 %vm405_vm0, %v2220_v44 }
 0x45e   : > { %v2425_v13 = vpop.f32.mrb[8].mxu1 }
 0x45f   : > { %v919_v14 = vadd.f32 %v2425_v13, %v823_v11  ;;  %v913_v15 = vpop.f32.mrb[9].mxu1  ;;  %v2222_v13 = vld [vmem:[%s3400_s3 + $0xb0] sm:$0xff] }
 0x460   : > { %v914_v16 = vadd.f32 %v913_v15, %v818_v12  ;;  %v2221_v12 = vld [vmem:[%s3400_s3 + $0xa8] sm:$0xff]  ;;  %v2232_v15 = vld [vmem:[%s3400_s3 + $0xc0] sm:$0xff] }
 0x461   : > { %v933_v17 = vmul.f32 0.5, %v919_v14  ;;  %v2223_v14 = vld [vmem:[%s3400_s3 + $0xb8] sm:$0xff] }
 0x462   : > { %v932_v19 = vmul.f32 0.5, %v914_v16  ;;  %v2428_v20 = vpop.f32.mrb[10].mxu1  ;;  %v1109_v16 = vpop.permute.xlu1 %1108 }
 0x463   : > { %2693 = vtanh.f32 %v933_v17  ;;  %v929_v22 = vadd.f32 %v2428_v20, %v833_v18  ;;  %v923_v23 = vpop.f32.mrb[11].mxu1 }
 0x464   : > { %2695 = vtanh.f32 %v932_v19  ;;  %v924_v24 = vadd.f32 %v923_v23, %v828_v21 }
 0x465   : > { %v935_v25 = vmul.f32 0.5, %v929_v22 }
 0x466   : > { %v934_v26 = vmul.f32 0.5, %v924_v24  ;;  %v1119_v23 = vpop.permute.xlu1 %1118 }
 0x467   : > { %2697 = vtanh.f32 %v935_v25 }
 0x468   : > { %2699 = vtanh.f32 %v934_v26 }
 0x46d   : > { %v2694_v27 = vpop.eup %2693 }
 0x46e   : > { %v2696_v28 = vpop.eup %2695  ;;  %v941_v29 = vadd.f32 1.0, %v2694_v27 }
 0x46f   : > { %v940_v30 = vadd.f32 1.0, %v2696_v28 }
 0x470   : > { %v945_v31 = vmul.f32 %v941_v29, %v933_v17  ;;  %v1104_v17 = vpop.permute.xlu0 %1103 }
 0x471   : > { %v2698_v32 = vpop.eup %2697  ;;  %v944_v33 = vmul.f32 %v940_v30, %v932_v19 }
 0x472   : > { %v2700_v34 = vpop.eup %2699  ;;  %v943_v35 = vadd.f32 1.0, %v2698_v32 }
 0x473   : > { %v942_v36 = vadd.f32 1.0, %v2700_v34  ;;  %v2562_v37 = vpack.c.bf16 %v945_v31, %v944_v33 }
 0x474   : > { %v947_v38 = vmul.f32 %v943_v35, %v935_v25 }
 0x475   : > { %v946_v39 = vmul.f32 %v942_v36, %v934_v26  ;;  %2563 = vmatprep.subr.bf16.mxu0 %v2562_v37  ;;  %v1114_v26 = vpop.permute.xlu0 %1113 }
 0x476   : > { %2565 = vmatpush3.bf16.msra.mxu0 %v2562_v37 }
 0x477   : > { %v2566_v40 = vpack.c.bf16 %v947_v38, %v946_v39 }
 0x479   : > { %2567 = vmatprep.subr.bf16.mxu0 %v2566_v40 }
 0x47a   : > { %2569 = vmatpush3.bf16.msra.mxu0 %v2566_v40 }
 0x47d   : > { %2438 = vmatmul.mubr.msk.f32.vlgmr.msra.gmra.mrb[4].mxu0 %vm405_vm0, %v2209_v41 }
 0x47e   : > { %2440 = vmatprep.mubr.msk.f32.mxu0 %vm405_vm0, %v2210_v42 }
 0x481   : > { %2441 = vmatmul.mubr.msk.f32.gmra.mrb[6].mxu0 %vm405_vm0, %v2211_v43 }
 0x482   : > { %2465 = vmatprep.mubr.msk.f32.mxu0 %vm405_vm0, %v2232_v15 }
 0x550   : > { %v2439_v47 = vpop.f32.mrb[4].mxu0 }
 0x551   : > { %v1062_v48 = vadd.f32 %v2439_v47, %v966_v45  ;;  %v1056_v49 = vpop.f32.mrb[5].mxu0  ;;  %v2234_v47 = vld [vmem:[%s3400_s3 + $0xd0] sm:$0xff] }
 0x552   : > { %v1057_v50 = vadd.f32 %v1056_v49, %v961_v46  ;;  %v2233_v46 = vld [vmem:[%s3400_s3 + $0xc8] sm:$0xff]  ;;  %v2244_v49 = vld [vmem:[%s3400_s3 + $0xe0] sm:$0xff] }
 0x553   : > { %v1076_v51 = vmul.f32 0.5, %v1062_v48  ;;  %v2235_v48 = vld [vmem:[%s3400_s3 + $0xd8] sm:$0xff] }
 0x554   : > { %v1075_v53 = vmul.f32 0.5, %v1057_v50  ;;  %v2442_v54 = vpop.f32.mrb[6].mxu0  ;;  %v1252_v50 = vpop.permute.xlu1 %1251 }
 0x555   : > { %2701 = vtanh.f32 %v1076_v51  ;;  %v1072_v56 = vadd.f32 %v2442_v54, %v976_v52  ;;  %v1066_v57 = vpop.f32.mrb[7].mxu0 }
 0x556   : > { %2703 = vtanh.f32 %v1075_v53  ;;  %v1067_v58 = vadd.f32 %v1066_v57, %v971_v55 }
 0x557   : > { %v1078_v59 = vmul.f32 0.5, %v1072_v56 }
 0x558   : > { %v1077_v61 = vmul.f32 0.5, %v1067_v58  ;;  %v1262_v57 = vpop.permute.xlu1 %1261 }
 0x559   : > { %2705 = vtanh.f32 %v1078_v59 }
 0x55a   : > { %2707 = vtanh.f32 %v1077_v61 }
 0x55f   : > { %v2702_v62 = vpop.eup %2701 }
 0x560   : > { %v2704_v63 = vpop.eup %2703  ;;  %v1084_v0 = vadd.f32 1.0, %v2702_v62 }
 0x561   : > { %v1083_v1 = vadd.f32 1.0, %v2704_v63 }
 0x562   : > { %v1088_v2 = vmul.f32 %v1084_v0, %v1076_v51  ;;  %v1247_v51 = vpop.permute.xlu0 %1246 }
 0x563   : > { %v2706_v3 = vpop.eup %2705  ;;  %v1087_v4 = vmul.f32 %v1083_v1, %v1075_v53 }
 0x564   : > { %v2708_v5 = vpop.eup %2707  ;;  %v1086_v6 = vadd.f32 1.0, %v2706_v3 }
 0x565   : > { %v1085_v7 = vadd.f32 1.0, %v2708_v5  ;;  %v2570_v8 = vpack.c.bf16 %v1088_v2, %v1087_v4 }
 0x566   : > { %v1090_v9 = vmul.f32 %v1086_v6, %v1078_v59 }
 0x567   : > { %v1089_v10 = vmul.f32 %v1085_v7, %v1077_v61  ;;  %2571 = vmatprep.subr.bf16.mxu1 %v2570_v8  ;;  %v1257_v61 = vpop.permute.xlu0 %1256 }
 0x568   : > { %2573 = vmatpush3.bf16.msra.mxu1 %v2570_v8 }
 0x569   : > { %v2574_v11 = vpack.c.bf16 %v1090_v9, %v1089_v10 }
 0x56b   : > { %2575 = vmatprep.subr.bf16.mxu1 %v2574_v11 }
 0x56c   : > { %2577 = vmatpush3.bf16.msra.mxu1 %v2574_v11 }
 0x56f   : > { %2452 = vmatmul.mubr.msk.f32.vlgmr.msra.gmra.mrb[12].mxu1 %vm405_vm0, %v2221_v12 }
 0x570   : > { %2454 = vmatprep.mubr.msk.f32.mxu1 %vm405_vm0, %v2222_v13 }
 0x573   : > { %2455 = vmatmul.mubr.msk.f32.gmra.mrb[14].mxu1 %vm405_vm0, %v2223_v14 }
 0x574   : > { %2479 = vmatprep.mubr.msk.f32.mxu1 %vm405_vm0, %v2244_v49 }
 0x642   : > { %v2453_v18 = vpop.f32.mrb[12].mxu1 }
 0x643   : > { %v1205_v19 = vadd.f32 %v2453_v18, %v1109_v16  ;;  %v1199_v20 = vpop.f32.mrb[13].mxu1  ;;  %v2246_v18 = vld [vmem:[%s3400_s3 + $0xf0] sm:$0xff] }
 0x644   : > { %v1200_v21 = vadd.f32 %v1199_v20, %v1104_v17  ;;  %v2245_v17 = vld [vmem:[%s3400_s3 + $0xe8] sm:$0xff]  ;;  %v2256_v20 = vld [vmem:[%s3400_s3 + $0x100] sm:$0xff] }
 0x645   : > { %v1219_v22 = vmul.f32 0.5, %v1205_v19  ;;  %v2247_v19 = vld [vmem:[%s3400_s3 + $0xf8] sm:$0xff] }
 0x646   : > { %v1218_v24 = vmul.f32 0.5, %v1200_v21  ;;  %v2456_v25 = vpop.f32.mrb[14].mxu1  ;;  %v1395_v21 = vpop.permute.xlu1 %1394 }
 0x647   : > { %2709 = vtanh.f32 %v1219_v22  ;;  %v1215_v27 = vadd.f32 %v2456_v25, %v1119_v23  ;;  %v1209_v28 = vpop.f32.mrb[15].mxu1 }
 0x648   : > { %2711 = vtanh.f32 %v1218_v24  ;;  %v1210_v29 = vadd.f32 %v1209_v28, %v1114_v26 }
 0x649   : > { %v1221_v30 = vmul.f32 0.5, %v1215_v27 }
 0x64a   : > { %v1220_v31 = vmul.f32 0.5, %v1210_v29  ;;  %v1405_v28 = vpop.permute.xlu1 %1404 }
 0x64b   : > { %2713 = vtanh.f32 %v1221_v30 }
 0x64c   : > { %2715 = vtanh.f32 %v1220_v31 }
 0x651   : > { %v2710_v32 = vpop.eup %2709 }
 0x652   : > { %v2712_v33 = vpop.eup %2711  ;;  %v1227_v34 = vadd.f32 1.0, %v2710_v32 }
 0x653   : > { %v1226_v35 = vadd.f32 1.0, %v2712_v33 }
 0x654   : > { %v1231_v36 = vmul.f32 %v1227_v34, %v1219_v22  ;;  %v1390_v22 = vpop.permute.xlu0 %1389 }
 0x655   : > { %v2714_v37 = vpop.eup %2713  ;;  %v1230_v38 = vmul.f32 %v1226_v35, %v1218_v24 }
 0x656   : > { %v2716_v39 = vpop.eup %2715  ;;  %v1229_v40 = vadd.f32 1.0, %v2714_v37 }
 0x657   : > { %v1228_v41 = vadd.f32 1.0, %v2716_v39  ;;  %v2578_v42 = vpack.c.bf16 %v1231_v36, %v1230_v38 }
 0x658   : > { %v1233_v43 = vmul.f32 %v1229_v40, %v1221_v30 }
 0x659   : > { %v1232_v44 = vmul.f32 %v1228_v41, %v1220_v31  ;;  %2579 = vmatprep.subr.bf16.mxu0 %v2578_v42  ;;  %v1400_v31 = vpop.permute.xlu0 %1399 }
 0x65a   : > { %2581 = vmatpush3.bf16.msra.mxu0 %v2578_v42 }
 0x65b   : > { %v2582_v45 = vpack.c.bf16 %v1233_v43, %v1232_v44 }
 0x65d   : > { %2583 = vmatprep.subr.bf16.mxu0 %v2582_v45 }
 0x65e   : > { %2585 = vmatpush3.bf16.msra.mxu0 %v2582_v45 }
 0x661   : > { %2466 = vmatmul.mubr.msk.f32.vlgmr.msra.gmra.mrb[8].mxu0 %vm405_vm0, %v2233_v46 }
 0x662   : > { %2468 = vmatprep.mubr.msk.f32.mxu0 %vm405_vm0, %v2234_v47 }
 0x665   : > { %2469 = vmatmul.mubr.msk.f32.gmra.mrb[10].mxu0 %vm405_vm0, %v2235_v48 }
 0x666   : > { %2493 = vmatprep.mubr.msk.f32.mxu0 %vm405_vm0, %v2256_v20 }
 0x734   : > { %v2467_v52 = vpop.f32.mrb[8].mxu0 }
 0x735   : > { %v1348_v53 = vadd.f32 %v2467_v52, %v1252_v50  ;;  %v1342_v54 = vpop.f32.mrb[9].mxu0  ;;  %v2258_v52 = vld [vmem:[%s3400_s3 + $0x110] sm:$0xff] }
 0x736   : > { %v1343_v55 = vadd.f32 %v1342_v54, %v1247_v51  ;;  %v2257_v51 = vld [vmem:[%s3400_s3 + $0x108] sm:$0xff]  ;;  %v2268_v54 = vld [vmem:[%s3400_s3 + $0x120] sm:$0xff] }
 0x737   : > { %v1362_v56 = vmul.f32 0.5, %v1348_v53  ;;  %v2259_v53 = vld [vmem:[%s3400_s3 + $0x118] sm:$0xff] }
 0x738   : > { %v1361_v58 = vmul.f32 0.5, %v1343_v55  ;;  %v2470_v59 = vpop.f32.mrb[10].mxu0  ;;  %v1538_v55 = vpop.permute.xlu1 %1537 }
 0x739   : > { %2717 = vtanh.f32 %v1362_v56  ;;  %v1358_v62 = vadd.f32 %v2470_v59, %v1262_v57  ;;  %v1352_v63 = vpop.f32.mrb[11].mxu0 }
 0x73a   : > { %2719 = vtanh.f32 %v1361_v58  ;;  %v1353_v0 = vadd.f32 %v1352_v63, %v1257_v61 }
 0x73b   : > { %v1364_v1 = vmul.f32 0.5, %v1358_v62 }
 0x73c   : > { %v1363_v2 = vmul.f32 0.5, %v1353_v0  ;;  %v1548_v63 = vpop.permute.xlu1 %1547 }
 0x73d   : > { %2721 = vtanh.f32 %v1364_v1 }
 0x73e   : > { %2723 = vtanh.f32 %v1363_v2 }
 0x743   : > { %v2718_v3 = vpop.eup %2717 }
 0x744   : > { %v2720_v4 = vpop.eup %2719  ;;  %v1370_v5 = vadd.f32 1.0, %v2718_v3 }
 0x745   : > { %v1369_v6 = vadd.f32 1.0, %v2720_v4 }
 0x746   : > { %v1374_v7 = vmul.f32 %v1370_v5, %v1362_v56  ;;  %v1533_v56 = vpop.permute.xlu0 %1532 }
 0x747   : > { %v2722_v8 = vpop.eup %2721  ;;  %v1373_v9 = vmul.f32 %v1369_v6, %v1361_v58 }
 0x748   : > { %v2724_v10 = vpop.eup %2723  ;;  %v1372_v11 = vadd.f32 1.0, %v2722_v8 }
 0x749   : > { %v1371_v12 = vadd.f32 1.0, %v2724_v10  ;;  %v2586_v13 = vpack.c.bf16 %v1374_v7, %v1373_v9 }
 0x74a   : > { %v1376_v14 = vmul.f32 %v1372_v11, %v1364_v1 }
 0x74b   : > { %v1375_v15 = vmul.f32 %v1371_v12, %v1363_v2  ;;  %2587 = vmatprep.subr.bf16.mxu1 %v2586_v13  ;;  %v1543_v2 = vpop.permute.xlu0 %1542 }
 0x74c   : > { %2589 = vmatpush3.bf16.msra.mxu1 %v2586_v13 }
 0x74d   : > { %v2590_v16 = vpack.c.bf16 %v1376_v14, %v1375_v15 }
 0x74f   : > { %2591 = vmatprep.subr.bf16.mxu1 %v2590_v16 }
 0x750   : > { %2593 = vmatpush3.bf16.msra.mxu1 %v2590_v16 }
 0x753   : > { %2480 = vmatmul.mubr.msk.f32.vlgmr.msra.gmra.mrb[16].mxu1 %vm405_vm0, %v2245_v17 }
 0x754   : > { %2482 = vmatprep.mubr.msk.f32.mxu1 %vm405_vm0, %v2246_v18 }
 0x757   : > { %2483 = vmatmul.mubr.msk.f32.gmra.mrb[18].mxu1 %vm405_vm0, %v2247_v19 }
 0x758   : > { %2507 = vmatprep.mubr.msk.f32.mxu1 %vm405_vm0, %v2268_v54 }
 0x826   : > { %v2481_v23 = vpop.f32.mrb[16].mxu1 }
 0x827   : > { %v1491_v24 = vadd.f32 %v2481_v23, %v1395_v21  ;;  %v1485_v25 = vpop.f32.mrb[17].mxu1  ;;  %v2270_v23 = vld [vmem:[%s3400_s3 + $0x130] sm:$0xff] }
 0x828   : > { %v1486_v26 = vadd.f32 %v1485_v25, %v1390_v22  ;;  %v2269_v22 = vld [vmem:[%s3400_s3 + $0x128] sm:$0xff]  ;;  %v2821_v25 = vmov 0.0|0.0  }
 0x829   : > { %v1505_v27 = vmul.f32 0.5, %v1491_v24  ;;  %v2271_v24 = vld [vmem:[%s3400_s3 + $0x138] sm:$0xff] }
 0x82a   : > { %v1504_v29 = vmul.f32 0.5, %v1486_v26  ;;  %v2484_v30 = vpop.f32.mrb[18].mxu1  ;;  %v2823_v26 = vmov 0.0  }
 0x82b   : > { %2725 = vtanh.f32 %v1505_v27  ;;  %v1501_v32 = vadd.f32 %v2484_v30, %v1405_v28  ;;  %v1495_v33 = vpop.f32.mrb[19].mxu1  ;;  %v1676_v28 = vpop.permute.xlu0 %1675 }
 0x82c   : > { %2727 = vtanh.f32 %v1504_v29  ;;  %v1496_v34 = vadd.f32 %v1495_v33, %v1400_v31 }
 0x82d   : > { %v1507_v35 = vmul.f32 0.5, %v1501_v32 }
 0x82e   : > { %v1506_v36 = vmul.f32 0.5, %v1496_v34 }
 0x82f   : > { %2729 = vtanh.f32 %v1507_v35 }
 0x830   : > { %2731 = vtanh.f32 %v1506_v36 }
 0x835   : > { %v2726_v37 = vpop.eup %2725 }
 0x836   : > { %v2728_v38 = vpop.eup %2727  ;;  %v1513_v39 = vadd.f32 1.0, %v2726_v37  ;;  %v1686_v37 = vpop.permute.xlu0 %1685 }
 0x837   : > { %v1512_v40 = vadd.f32 1.0, %v2728_v38 }
 0x838   : > { %v1517_v41 = vmul.f32 %v1513_v39, %v1505_v27  ;;  %v1681_v27 = vpop.permute.xlu1 %1680 }
 0x839   : > { %v2730_v42 = vpop.eup %2729  ;;  %v1516_v43 = vmul.f32 %v1512_v40, %v1504_v29 }
 0x83a   : > { %v2732_v44 = vpop.eup %2731  ;;  %v1515_v45 = vadd.f32 1.0, %v2730_v42 }
 0x83b   : > { %v1514_v46 = vadd.f32 1.0, %v2732_v44  ;;  %v2594_v47 = vpack.c.bf16 %v1517_v41, %v1516_v43 }
 0x83c   : > { %v1519_v48 = vmul.f32 %v1515_v45, %v1507_v35  ;;  %v1691_v34 = vpop.permute.xlu1 %1690 }
 0x83d   : > { %v1518_v49 = vmul.f32 %v1514_v46, %v1506_v36  ;;  %2595 = vmatprep.subr.bf16.mxu0 %v2594_v47 }
 0x83e   : > { %2597 = vmatpush3.bf16.msra.mxu0 %v2594_v47 }
 0x83f   : > { %v2598_v50 = vpack.c.bf16 %v1519_v48, %v1518_v49 }
 0x841   : > { %2599 = vmatprep.subr.bf16.mxu0 %v2598_v50 }
 0x842   : > { %2601 = vmatpush3.bf16.msra.mxu0 %v2598_v50 }
 0x843   : > { %2610 = vmatprep.subr.bf16.mxu0 %v2821_v25 }
 0x845   : > { %2494 = vmatmul.mubr.msk.f32.vlgmr.msra.gmra.mrb[12].mxu0 %vm405_vm0, %v2257_v51 }
 0x846   : > { %2496 = vmatprep.mubr.msk.f32.mxu0 %vm405_vm0, %v2258_v52 }
 0x849   : > { %2497 = vmatmul.mubr.msk.f32.gmra.mrb[14].mxu0 %vm405_vm0, %v2259_v53 }
 0x84a   : > { %2521 = vmatprep.mubr.msk.f32.mxu0 %vm2822_vm1, %v2823_v26 }
 0x918   : > { %v2495_v57 = vpop.f32.mrb[12].mxu0 }
 0x919   : > { %v1634_v58 = vadd.f32 %v2495_v57, %v1538_v55  ;;  %v1628_v59 = vpop.f32.mrb[13].mxu0  ;;  %v1806_v57 = vld [vmem:[%s3402_s5] sm:$0xff] }
 0x91a   : > { %v1629_v61 = vadd.f32 %v1628_v59, %v1533_v56  ;;  %v1808_v59 = vld [vmem:[%s3402_s5 + $0x10] sm:$0x7f] }
 0x91b   : > { %v1648_v62 = vmul.f32 0.5, %v1634_v58  ;;  %v1807_v58 = vld [vmem:[%s3402_s5 + $0x8] sm:$0xff] }
 0x91c   : > { %v1647_v0 = vmul.f32 0.5, %v1629_v61  ;;  %v2498_v1 = vpop.f32.mrb[14].mxu0  ;;  %v3270_v61 = vld [vmem:[%s3089_s10] sm:$0x3f]  ;;  %s294_s10 = sand.u32 1, %s2810_s28  }
 0x91d   : > { %2733 = vtanh.f32 %v1648_v62  ;;  %v1644_v3 = vadd.f32 %v2498_v1, %v1548_v63  ;;  %v1638_v4 = vpop.f32.mrb[15].mxu0  ;;  %v3277_v63 = vmul.f32 %v3270_v61, %v3270_v61  ;;  %s295_s13 = scalar_lea.vmem [#allocation2], %s294_s10  ;;  %s2096_s21 = scalar_lea.sflag [#allocation3], %s294_s10 }
 0x91e   : > { %2735 = vtanh.f32 %v1647_v0  ;;  %v1639_v5 = vadd.f32 %v1638_v4, %v1543_v2  ;;  %v3285_v2 = vrot.slane %v3270_v61, 2  ;;  %v3290_v4 = vrot.slane %v3270_v61, 1  ;;  %s2108_s17 = sshll.u32 %s295_s13, 4  ;;  %s3357_s17 = int_to_ptr.vmem [resolvable:$true] %s2108_s17 }
 0x91f   : > { %v1650_v6 = vmul.f32 0.5, %v1644_v3  ;;  %v1948_v3 = vmul.f32 %v3277_v63, %v3277_v63  ;;  %s2756_s22 = scalar_lea.vmem %s3357_s17, 16  ;;  %p2763_p0 = scmp.lt.s32.totalorder %s3357_s17, %s2761_s23 }
 0x920   : > { %v1649_v7 = vmul.f32 0.5, %v1639_v5  ;;  %v1975_v5 = vrot.slane %v3277_v63, 6  ;;  %p2757_p11 = scmp.ne.s32.totalorder %s3357_s17, %s2756_s22  ;;  %p2764_p1 = scmp.lt.s32.totalorder %s2762_s24, %s2756_s22 }
 0x921   : > { %2737 = vtanh.f32 %v1650_v6 }
 0x922   : > { %2739 = vtanh.f32 %v1649_v7  ;;  %p2758_p12 = pnand %p2757_p11, %p2908_p5  ;;  %p2765_p2 = por %p2764_p1, %p2763_p0 }
 0x924   : > { %p2759_p13 = pneg %p2758_p12 }
 0x926   : > { %p2766_p3 = pnand %p2765_p2, %p2759_p13 }
 0x927   : > { %v2734_v8 = vpop.eup %2733 }
 0x928   : > { %v2736_v9 = vpop.eup %2735  ;;  %v1656_v10 = vadd.f32 1.0, %v2734_v8  ;;  %v1974_v8 = vmul.f32 %v3270_v61, %v3285_v2 }
 0x929   : > { %v1655_v11 = vadd.f32 1.0, %v2736_v9  ;;  %v1990_v9 = vrot.slane %v3277_v63, 2 }
 0x92a   : > { %v1660_v12 = vmul.f32 %v1656_v10, %v1648_v62  ;;  %v3273_v62 = vrot.slane %v3270_v61, 5  ;;  %v1979_v10 = vrot.slane %v3270_v61, 3 }
 0x92b   : > { %v2738_v13 = vpop.eup %2737  ;;  %v1659_v14 = vmul.f32 %v1655_v11, %v1647_v0  ;;  %v1962_v0 = vrot.slane %v3270_v61, 7  ;;  %v1950_v11 = vrot.slane %v3277_v63, 7 }
 0x92c   : > { %v2740_v15 = vpop.eup %2739  ;;  %v1658_v16 = vadd.f32 1.0, %v2738_v13  ;;  %v3282_v1 = vmul.f32 %v3270_v61, %v3273_v62  ;;  %v2002_v13 = vrot.slane %v1948_v3, 2 }
 0x92d   : > { %v1657_v17 = vadd.f32 1.0, %v2740_v15  ;;  %v2602_v18 = vpack.c.bf16 %v1660_v12, %v1659_v14  ;;  %v1953_v12 = vrot.slane %v3277_v63, 5  ;;  %v1992_v14 = vmul.f32 %v3270_v61, %v1990_v9 }
 0x92e   : > { %v1662_v19 = vmul.f32 %v1658_v16, %v1650_v6  ;;  %v1922_v6 = vpop.permute.xlu0 %1921  ;;  %v1977_v15 = vmul.f32 %v1975_v5, %v3282_v1  ;;  %v1986_v16 = vmul.f32 %v3270_v61, %v3290_v4 }
 0x92f   : > { %v1661_v20 = vmul.f32 %v1657_v17, %v1649_v7  ;;  %2603 = vmatprep.subr.bf16.mxu1 %v2602_v18  ;;  %v1971_v7 = vmul.f32 %v3282_v1, %v1962_v0  ;;  %v1934_v17 = vmul.f32 %v1922_v6, %v3092_v60 }
 0x930   : > { %2605 = vmatpush3.bf16.msra.mxu1 %v2602_v18 }
 0x931   : > { %v2606_v21 = vpack.c.bf16 %v1662_v19, %v1661_v20  ;;  %v2017_v18 = vrot.slane %v1971_v7, 4  ;;  %v2020_v19 = vrot.slane %v1974_v8, 2  ;;  %v1927_v20 = vpop.permute.xlu1 %1926 }
 0x933   : > { %2607 = vmatprep.subr.bf16.mxu1 %v2606_v21 }
 0x934   : > { %2609 = vmatpush3.bf16.msra.mxu1 %v2606_v21  ;;  %v1947_v21 = vmul.f32 %v3270_v61, %v3277_v63 }
 0x936   : > { %v1988_v6 = vmul.f32 %v3285_v2, %v1947_v21 }
 0x937   : > { %2508 = vmatmul.mubr.msk.f32.vlgmr.msra.gmra.mrb[20].mxu1 %vm405_vm0, %v2269_v22  ;;  %v1981_v22 = vmul.f32 %v1979_v10, %v3277_v63 }
 0x938   : > { %2510 = vmatprep.mubr.msk.f32.mxu1 %vm405_vm0, %v2270_v23  ;;  %v1932_v23 = vpop.permute.xlu0 %1931 }
 0x93b   : > { %2511 = vmatmul.mubr.msk.f32.gmra.mrb[22].mxu1 %vm405_vm0, %v2271_v24  ;;  %v1952_v24 = vmul.f32 %v1950_v11, %v3277_v63 }
 0xa0a   : > { %v2509_v29 = vpop.f32.mrb[20].mxu1 }
 0xa0b   : > { %v1777_v30 = vadd.f32 %v2509_v29, %v1681_v27  ;;  %v1771_v31 = vpop.f32.mrb[21].mxu1  ;;  %v1978_v27 = vmul.f32 %v3270_v61, %v1953_v12  ;;  %v1989_v29 = vmul.f32 %v1986_v16, %v3285_v2 }
 0xa0c   : > { %v1772_v32 = vadd.f32 %v1771_v31, %v1676_v28  ;;  %v1993_v28 = vmul.f32 %v1992_v14, %v1962_v0  ;;  %v1935_v31 = vmul.f32 %v1927_v20, %v3092_v60 }
 0xa0d   : > { %v1791_v33 = vmul.f32 0.5, %v1777_v30  ;;  %v2023_v30 = vrot.slane %v1977_v15, 2 }
 0xa0e   : > { %v1790_v35 = vmul.f32 0.5, %v1772_v32  ;;  %v2512_v36 = vpop.f32.mrb[22].mxu1  ;;  %v1937_v32 = vmul.f32 1.442695, %v1934_v17 }
 0xa0f   : > { %2741 = vtanh.f32 %v1791_v33  ;;  %v1787_v38 = vadd.f32 %v2512_v36, %v1691_v34  ;;  %v1781_v39 = vpop.f32.mrb[23].mxu1  ;;  %v1936_v34 = vmul.f32 %v1932_v23, %v3092_v60  ;;  %v1958_v36 = vrot.slane %v1947_v21, 1 }
 0xa10   : > { %2743 = vtanh.f32 %v1790_v35  ;;  %v1782_v40 = vadd.f32 %v1781_v39, %v1686_v37  ;;  %v2026_v39 = vrot.slane %v1978_v27, 2  ;;  %v1964_v60 = vmul.f32 %v3270_v61, %v1962_v0 }
 0xa11   : > { %v1793_v41 = vmul.f32 0.5, %v1787_v38 }
 0xa12   : > { %v1792_v42 = vmul.f32 0.5, %v1782_v40  ;;  %v1967_v5 = vmul.f32 %v3290_v4, %v1964_v60 }
 0xa13   : > { %2745 = vtanh.f32 %v1793_v41 }
 0xa14   : > { %2747 = vtanh.f32 %v1792_v42  ;;  %v2014_v17 = vrot.slane %v1967_v5, 3 }
 0xa15   : > { %2749 = vpow2.f32 %v1937_v32 }
 0xa19   : > { %v2742_v43 = vpop.eup %2741 }
 0xa1a   : > { %v2744_v44 = vpop.eup %2743  ;;  %v1799_v45 = vadd.f32 1.0, %v2742_v43  ;;  %v1939_v43 = vmul.f32 1.442695, %v1935_v31 }
 0xa1b   : > { %v1798_v46 = vadd.f32 1.0, %v2744_v44  ;;  %v1956_v44 = vmul.f32 %v3270_v61, %v1950_v11 }
 0xa1c   : > { %v1803_v47 = vmul.f32 %v1799_v45, %v1791_v33  ;;  %v2051_v33 = vsel %vm2037_vm2, %v2017_v18, %v2020_v19  ;;  %v1983_v45 = vrot.slane %v3270_v61, 4  ;;  %2751 = vpow2.f32 %v1939_v43 }
 0xa1d   : > { %v2746_v48 = vpop.eup %2745  ;;  %v1802_v49 = vmul.f32 %v1798_v46, %v1790_v35  ;;  %v1982_v35 = vmul.f32 %v1981_v22, %v3290_v4  ;;  %v2052_v40 = vsel %vm2039_vm3, %v2051_v33, %v2023_v30  ;;  %v1996_v46 = vrot.slane %v3277_v63, 1  ;;  %v1820_v22 = vpop.permute.xlu0 %1819 }
 0xa1e   : > { %v2748_v50 = vpop.eup %2747  ;;  %v1801_v51 = vadd.f32 1.0, %v2746_v48  ;;  %v1995_v48 = vmul.f32 %v1990_v9, %v3277_v63  ;;  %v2035_v18 = vrot.slane %v1988_v6, 3  ;;  %v2000_v19 = vmul.f32 %v3290_v4, %v3277_v63 }
 0xa1f   : > { %v2611_v52 = vpack.c.bf16 %v1803_v47, %v1802_v49  ;;  %v1800_v53 = vadd.f32 1.0, %v2748_v50  ;;  %v2029_v47 = vrot.slane %v1982_v35, 5  ;;  %v2053_v50 = vsel %vm2041_vm4, %v2052_v40, %v2026_v39  ;;  %v2750_v2 = vpop.eup %2749 }
 0xa20   : > { %v1805_v54 = vmul.f32 %v1801_v51, %v1793_v41  ;;  %v2059_v41 = vrot.slane %v1989_v29, 2  ;;  %v1994_v51 = vmul.f32 %v1979_v10, %v1974_v8  ;;  %v2065_v3 = vrot.slane %v1995_v48, 7 }
 0xa21   : > { %v1804_v55 = vmul.f32 %v1800_v53, %v1792_v42  ;;  %2612 = vmatpush3.bf16.msra.mxu0 %v2611_v52  ;;  %v2062_v42 = vrot.slane %v1993_v28, 1  ;;  %v1941_v52 = vmul.f32 1.442695, %v1936_v34  ;;  %v1960_v53 = vmul.f32 %v3270_v61, %v1958_v36 }
 0xa22   : > { %2613 = vmatprep.subr.bf16.mxu0 %v2821_v25  ;;  %v1955_v25 = vmul.f32 %v1953_v12, %v3277_v63  ;;  %v2054_v0 = vsel %vm2043_vm5, %v2053_v50, %v2029_v47  ;;  %v1999_v10 = vmul.f32 %v3273_v62, %v1947_v21  ;;  %v2074_v31 = vrot.slane %v2000_v19, 6 }
 0xa23   : > { %v2614_v56 = vpack.c.bf16 %v1805_v54, %v1804_v55  ;;  %v1987_v54 = vmul.f32 %v1986_v16, %v3273_v62  ;;  %v2076_v55 = vsel %vm2037_vm2, %v2059_v41, %v2062_v42  ;;  %2753 = vpow2.f32 %v1941_v52 }
 0xa24   : > { %v2005_v37 = vrot.slane %v1955_v25, 1  ;;  %v2077_v7 = vsel %vm2039_vm3, %v2076_v55, %v1994_v51  ;;  %v2011_v8 = vrot.slane %v1960_v53, 3  ;;  %v2071_v21 = vrot.slane %v1999_v10, 7 }
 0xa25   : > { %2615 = vmatpush3.bf16.msra.mxu0 %v2614_v56  ;;  %v2008_v56 = vrot.slane %v1956_v44, 6  ;;  %v2078_v16 = vsel %vm2041_vm4, %v2077_v7, %v2065_v3 }
 0xa26   : > { %v2752_v28 = vpop.eup %2751 }
 0xa28   : > { %2522 = vmatmul.mubr.msk.f32.vlgmr.msra.gmra.mrb[16].mxu0 %vm405_vm0, %v1806_v57  ;;  %v1985_v57 = vmul.f32 %v1983_v45, %v3282_v1  ;;  %v1815_v1 = vpop.permute.xlu1 %1814 }
 0xa29   : > { %2524 = vmatprep.mubr.msk.f32.mxu0 %vm2822_vm1, %v2823_v26 }
 0xa2a   : > { %v2055_v12 = vsel %vm2045_vm6, %v2054_v0, %v1985_v57 }
 0xa2c   : > { %2525 = vmatmul.mubr.msk.f32.gmra.mrb[18].mxu0 %vm405_vm0, %v1807_v58  ;;  %v1998_v58 = vmul.f32 %v3270_v61, %v1996_v46  ;;  %v1825_v32 = vpop.permute.xlu1 %1824 }
 0xa2d   : > { %2527 = vmatprep.mubr.msk.f32.mxu0 %vm2822_vm1, %v2823_v26  ;;  %v2038_v26 = vsel %vm2037_vm2, %v2002_v13, %v1990_v9  ;;  %v2032_v9 = vrot.slane %v1987_v54, 6  ;;  %v2754_v34 = vpop.eup %2753 }
 0xa2e   : > { %v2040_v38 = vsel %vm2039_vm3, %v2038_v26, %v1952_v24  ;;  %v2068_v13 = vrot.slane %v1998_v58, 7 }
 0xa2f   : > { %v2042_v49 = vsel %vm2041_vm4, %v2040_v38, %v2005_v37  ;;  %v2056_v20 = vsel %vm2047_vm7, %v2055_v12, %v2032_v9 }
 0xa30   : > { %2528 = vmatmul.mubr.msk.f32.gmra.mrb[20].mxu0 %vm405_vm0, %v1808_v59  ;;  %v2044_v59 = vsel %vm2043_vm5, %v2042_v49, %v1996_v46  ;;  %v2079_v24 = vsel %vm2043_vm5, %v2078_v16, %v2068_v13  ;;  %v2057_v30 = vsel %vm2049_vm8, %v2056_v20, %v2035_v18 }
 0xa31   : > { %v2046_v61 = vsel %vm2045_vm6, %v2044_v59, %v2008_v56  ;;  %v2080_v4 = vsel %vm2045_vm6, %v2079_v24, %v2071_v21 }
 0xa32   : > { %v2048_v62 = vsel %vm2047_vm7, %v2046_v61, %v2011_v8  ;;  %v2081_v39 = vsel %vm2047_vm7, %v2080_v4, %v2074_v31 }
 0xa33   : > { %v2050_v29 = vsel %vm2049_vm8, %v2048_v62, %v2014_v17 }
 0xafb   : > { %v1902_v11 = vpop.f32.mrb[16].mxu0 }
 0xafc   : > { %v1903_v14 = vadd.f32 %v1902_v11, %v1815_v1  ;;  %v2523_v15 = vpop.f32.mrb[17].mxu0 }
 0xafe   : > { %v1943_v25 = vmul.f32 %v2750_v2, %v1903_v14 }
 0xaff   : > { %v1907_v23 = vpop.f32.mrb[18].mxu0 }
 0xb00   : > { %v1908_v26 = vadd.f32 %v1907_v23, %v1820_v22  ;;  %v2526_v27 = vpop.f32.mrb[19].mxu0  ;;  %v2082_v35 = vmul.f32 %v2050_v29, %v1943_v25 }
 0xb02   : > { %v1944_v63 = vmul.f32 %v2752_v28, %v1908_v26 }
 0xb03   : > { %v1912_v33 = vpop.f32.mrb[20].mxu0 }
 0xb04   : > { %v2083_v36 = vmul.f32 %v2057_v30, %v1944_v63  ;;  %v1913_v37 = vadd.f32 %v1912_v33, %v1825_v32  ;;  %v2529_v38 = vpop.f32.mrb[21].mxu0 }
 0xb06   : > { %v2085_v40 = vadd.f32 %v2083_v36, %v2082_v35  ;;  %v1945_v41 = vmul.f32 %v2754_v34, %v1913_v37 }
 0xb08   : > { %v2084_v42 = vmul.f32 %v2081_v39, %v1945_v41 }
 0xb0a   : > { %v2086_v43 = vsel %vm2049_vm8, %v2084_v42, 0.0 }
 0xb0b   : > { %v2087_v44 = vadd.f32 %v2086_v43, %v2085_v40 }
 0xb0d   : > { %v2088_v45 = vrot.slane %v2087_v44, 4 }
 0xb0f   : > { %v2089_v60 = vadd.f32 %v2088_v45, %v2087_v44 }
 0xb11   : > { %v2090_v46 = vrot.slane %v2089_v60, 2 }
 0xb13   : > { %v2091_v47 = vadd.f32 %v2090_v46, %v2089_v60 }
 0xb15   : > { %v2092_v48 = vrot.slane %v2091_v47, 1 }
 0xb17   : > { %v2093_v49 = vadd.f32 %v2092_v48, %v2091_v47 }
 0xb19   : > { %2094 = vst [vmem:[%s295_s13] sm:$0x1] %v2093_v49 }
 0xb1a   : > { %2769 = shalt.err (!%p2766_p3)
}
 0xb1b   : > { %s2770_s25 = scalar_lea.hbm %s3355_s20, 16  ;;  %s2774_s12 = scalar_lea.hbm %s3405_s8, 64 }
 0xb1c   : > { %p2771_p4 = scmp.ne.s32.totalorder %s3355_s20, %s2770_s25  ;;  %p2775_p9 = scmp.lt.u32.totalorder %s3355_s20, %s3405_s8 }
 0xb1d   : > { %p2776_p10 = scmp.lt.u32.totalorder %s2774_s12, %s2770_s25  ;;  %p2778_p12 = scmp.lt.u32.totalorder %s2770_s25, %s3355_s20 }
 0xb1e   : > { %p2772_p7 = pnand %p2771_p4, %p2908_p5 }
 0xb1f   : > { %p2777_p11 = por %p2776_p10, %p2775_p9 }
 0xb20   : > { %p2773_p8 = pneg %p2772_p7 }
 0xb21   : > { %p2779_p13 = por %p2778_p12, %p2777_p11 }
 0xb23   : > { %p2780_p0 = pnand %p2779_p13, %p2773_p8 }
 0xb25   : > { %2783 = shalt.err (!%p2780_p0)
}
 0xb26   : > { %2616 = dma.vmem_to_hbm [thread:$0]  (%p2908_p5), %s3357_s17, 16, %s3355_s20, %s2096_s21  }
 0xb27 PF: > { %p2622_p1 = scmp.ge.s32.totalorder %s2818_s30, 2  ;;  %s2120_s19 = sand.u32 1, %s2806_s27  }
 0xb28   : > { %s2121_s22 = scalar_lea.sflag [#allocation3], %s2120_s19 }
 0xb29   : > { %p2619_p2 = pnand %p2622_p1, %p2912_p6 }
 0xb2b   : > { %2801 = dma.done.wait (!%p2619_p2), %s2121_s22, 16  }
 0xb2c   : > { %2803 = vsyncadd (!%p2619_p2), %s2121_s22, 4294967280  ;;  %p18_p3 = scmp.ge.s32.totalorder %s2895_s11, 6   ;;  %s3408_s27 = smov %s2810_s28 }
 0xb2d   : > { %s3409_s28 = smov %s2814_s29  ;;  %s3410_s29 = smov %s2906_s14 }
 0xb2e   : > { %s3411_s30 = smov %s2895_s11  ;;  %20 = sbr.rel (!%p18_p3) target bundleno = 3 (0x3), region = 105 }
 0xb35   :  { %2125 = vsyncpa [#allocation3], 1 }
 0xb36   :  { %2127 = vsyncpa [#allocation3 + $0x1], 1 }

</bundles_post_ra>
